<compile_context>
chip_gen: v7x
topology: tpu7x:2x2x1
jax: 0.10.0
libtpu: 0.0.40
codegen_flags: <defaults>
</compile_context>

<pallas_src>
import functools

import jax
import jax.numpy as jnp
from jax.experimental import pallas as pl
from jax.experimental.pallas import tpu as pltpu


# ----------------------------------------------------------------------------
# Fused kernel: token one-hot projection + GRU recurrence + attention + heads
# ----------------------------------------------------------------------------
def _decoder_kernel(ids_ref, h0_ref, gir_ref, giz_ref, gin_ref,
                    whr_ref, whz_ref, whn_ref, bhr_ref, bhz_ref, bhn_ref,
                    enc_ref, wc_ref, wd_ref, batt_ref, wfc_ref, bfc_ref,
                    logits_ref, hT_ref):
    B, H = h0_ref.shape
    TB = ids_ref.shape[0]
    T = TB // B
    V = gir_ref.shape[0]

    # --- (1) token one-hot (time-major rows: n = t*B + b) and per-gate input
    #     projections for ALL timesteps: three small MXU ops, off the chain.
    #     gi tables already contain emb @ Wih_g^T + bih_g (precomputed once).
    ids = ids_ref[...]                                            # (TB, 1) i32
    iota = jax.lax.broadcasted_iota(jnp.int32, (TB, V), 1)
    onehot = jnp.where(ids == iota, 1.0, 0.0).astype(jnp.float32)   # (TB, V)
    gi_r = jnp.dot(onehot, gir_ref[...], preferred_element_type=jnp.float32)
    gi_z = jnp.dot(onehot, giz_ref[...], preferred_element_type=jnp.float32)
    gi_n = jnp.dot(onehot, gin_ref[...], preferred_element_type=jnp.float32)

    # --- (2) serial GRU recurrence (PyTorch gate order r, z, n), unrolled.
    #     Gates are pre-split so no lane slicing sits on the h chain.
    whr, whz, whn = whr_ref[...], whz_ref[...], whn_ref[...]
    bhr, bhz, bhn = bhr_ref[...], bhz_ref[...], bhn_ref[...]
    h = h0_ref[...]                                               # (B, H)
    hs = []
    for t in range(T):
        lo = t * B
        gh_r = jnp.dot(h, whr, preferred_element_type=jnp.float32) + bhr
        gh_z = jnp.dot(h, whz, preferred_element_type=jnp.float32) + bhz
        gh_n = jnp.dot(h, whn, preferred_element_type=jnp.float32) + bhn
        r = jax.nn.sigmoid(gi_r[lo:lo + B, :] + gh_r)
        z = jax.nn.sigmoid(gi_z[lo:lo + B, :] + gh_z)
        n = jnp.tanh(gi_n[lo:lo + B, :] + r * gh_n)
        h = (1.0 - z) * n + z * h
        hs.append(h)
    hT_ref[...] = h

    # --- (3) attention + tanh(atteniton_fc([c, dec])) + fc, per batch element
    #     (B tiny & static -> unrolled; everything stays 2-D, no scratch).
    wc, wd = wc_ref[...], wd_ref[...]
    batt = batt_ref[...]
    wfc, bfc = wfc_ref[...], bfc_ref[...]
    outs = []
    for b in range(B):
        dec_b = jnp.concatenate([hh[b:b + 1, :] for hh in hs], axis=0)   # (T,H)
        enc_b = enc_ref[b]                                               # (S,H)

        # scores (T, S) = dec_b . enc_b^T ; softmax reduces over the lane axis S
        s = jax.lax.dot_general(dec_b, enc_b, (((1,), (1,)), ((), ())),
                                preferred_element_type=jnp.float32)
        s = s - jnp.max(s, axis=-1, keepdims=True)
        e = jnp.exp(s)
        p = e / jnp.sum(e, axis=-1, keepdims=True)                # exact divide

        c = jnp.dot(p, enc_b, preferred_element_type=jnp.float32)        # (T,H)

        att = jnp.tanh(
            jnp.dot(c, wc, preferred_element_type=jnp.float32)
            + jnp.dot(dec_b, wd, preferred_element_type=jnp.float32)
            + batt)

        outs.append(jnp.dot(att, wfc, preferred_element_type=jnp.float32)
                    + bfc)                                               # (T,Vp)

    # single lane-dense (B*T, Vp) store (rows batch-major: row = b*T + t)
    logits_ref[...] = jnp.concatenate(outs, axis=0)


def decoder_pallas_call(ids_tm, h0, gir, giz, gin, whr, whz, whn,
                        bhr, bhz, bhn, enc, wc, wd, batt, wfc_pad, bfc_pad):
    TB = ids_tm.shape[0]
    B, H = h0.shape
    V = gir.shape[0]
    S = enc.shape[1]
    Vp = wfc_pad.shape[-1]

    def full(*shape):
        return pl.BlockSpec(shape, lambda *_: (0,) * len(shape))

    return pl.pallas_call(
        _decoder_kernel,
        out_shape=(jax.ShapeDtypeStruct((TB, Vp), jnp.float32),
                   jax.ShapeDtypeStruct((B, H), jnp.float32)),
        grid_spec=pltpu.PrefetchScalarGridSpec(
            num_scalar_prefetch=0,
            grid=(1,),
            in_specs=[
                full(TB, 1),                              # token ids (time-major)
                full(B, H),                               # h0
                full(V, H), full(V, H), full(V, H),       # gi tables r/z/n
                full(H, H), full(H, H), full(H, H),       # Whh^T r/z/n
                full(1, H), full(1, H), full(1, H),       # bhh r/z/n
                full(B, S, H),                            # encoder output
                full(H, H), full(H, H),                   # atteniton_fc halves
                full(1, H),                               # atteniton_fc bias
                full(H, Vp), full(1, Vp),                 # fc weight / bias (padded)
            ],
            out_specs=[full(TB, Vp), full(B, H)],
        ),
        compiler_params=pltpu.CompilerParams(
            dimension_semantics=("arbitrary",)),
    )(ids_tm, h0, gir, giz, gin, whr, whz, whn, bhr, bhz, bhn,
      enc, wc, wd, batt, wfc_pad, bfc_pad)


# ----------------------------------------------------------------------------
# Parameters: raw (PyTorch layout) + one-time preparation for the kernel
# ----------------------------------------------------------------------------
def init_decoder_params(key, input_dim, emb_dim, hidden_dim, mod):
    """Raw parameters in PyTorch layout (nn.Embedding / nn.GRU / nn.Linear)."""
    hiddens = hidden_dim * 2 if mod == 0 else hidden_dim
    ks = jax.random.split(key, 8)
    s = 0.1
    p = {
        "emb":  jax.random.uniform(ks[0], (input_dim, emb_dim), jnp.float32, -s, s),
        "wih":  jax.random.uniform(ks[1], (3 * hiddens, emb_dim), jnp.float32, -s, s),
        "whh":  jax.random.uniform(ks[2], (3 * hiddens, hiddens), jnp.float32, -s, s),
        "bih":  jax.random.uniform(ks[3], (3 * hiddens,), jnp.float32, -s, s),
        "bhh":  jax.random.uniform(ks[4], (3 * hiddens,), jnp.float32, -s, s),
        # atteniton_fc: Linear(2*hiddens, hiddens)  (see NOTE at top)
        "watt": jax.random.uniform(ks[5], (hiddens, 2 * hiddens), jnp.float32, -s, s),
        "batt": jax.random.uniform(ks[6], (hiddens,), jnp.float32, -s, s),
        # fc: Linear(hiddens, input_dim)
        "wfc":  jax.random.uniform(ks[7], (input_dim, hiddens), jnp.float32, -s, s),
        "bfc":  jnp.zeros((input_dim,), jnp.float32),
    }
    return p, hiddens


def prepare_decoder_params(params, hiddens):
    """ONE-TIME preprocessing, hoisted out of the jitted forward:
    transposes, per-gate splits, vocab padding, and fusing nn.Embedding with
    the GRU input projection into per-gate (V, H) tables gi_g = emb@Wih_g^T+b.
    """
    H = hiddens
    V = params["wfc"].shape[0]
    Vp = ((V + 127) // 128) * 128
    gi_tab = params["emb"] @ params["wih"].T + params["bih"]     # (V, 3H)
    whh_t = params["whh"].T                                      # (H, 3H)
    watt_t = params["watt"].T                                    # (2H, H)
    prepped = {
        "gir": gi_tab[:, :H], "giz": gi_tab[:, H:2 * H], "gin": gi_tab[:, 2 * H:],
        "whr": whh_t[:, :H], "whz": whh_t[:, H:2 * H], "whn": whh_t[:, 2 * H:],
        "bhr": params["bhh"][None, :H],
        "bhz": params["bhh"][None, H:2 * H],
        "bhn": params["bhh"][None, 2 * H:],
        "wc": watt_t[:H, :], "wd": watt_t[H:, :],
        "batt": params["batt"][None, :],
        "wfc": jnp.pad(params["wfc"].T, ((0, 0), (0, Vp - V))),   # (H, Vp)
        "bfc": jnp.pad(params["bfc"], (0, Vp - V))[None, :],      # (1, Vp)
    }
    prepped = {k: jnp.asarray(v, jnp.float32) for k, v in prepped.items()}
    return prepped, V


@functools.partial(jax.jit, static_argnames=("vocab",))
def decoder_forward(prepped, token_seq, hidden_state, enc_output, *, vocab):
    B, T = token_seq.shape
    # time-major flat token ids (row = t*B + b); only a tiny int32 reshape
    # remains on the per-call wrapper path.
    ids_tm = jnp.reshape(jnp.transpose(token_seq).astype(jnp.int32), (T * B, 1))

    logits_pad, hT = decoder_pallas_call(
        ids_tm, hidden_state,
        prepped["gir"], prepped["giz"], prepped["gin"],
        prepped["whr"], prepped["whz"], prepped["whn"],
        prepped["bhr"], prepped["bhz"], prepped["bhn"],
        enc_output,
        prepped["wc"], prepped["wd"], prepped["batt"],
        prepped["wfc"], prepped["bfc"])

    logits = jnp.reshape(logits_pad, (B, T, -1))[:, :, :vocab]
    return logits, hT[None]                                      # hidden: (1, B, H)


# ----------------------------------------------------------------------------
# Pure-JAX reference (for a correctness check, on the raw PyTorch-layout params)
# ----------------------------------------------------------------------------
def decoder_reference(params, token_seq, h0, enc):
    H = h0.shape[-1]
    emb = jnp.take(params["emb"], token_seq, axis=0)

    def step(h, x):
        gi = x @ params["wih"].T + params["bih"]
        gh = h @ params["whh"].T + params["bhh"]
        r = jax.nn.sigmoid(gi[:, :H] + gh[:, :H])
        z = jax.nn.sigmoid(gi[:, H:2 * H] + gh[:, H:2 * H])
        n = jnp.tanh(gi[:, 2 * H:] + r * gh[:, 2 * H:])
        hn = (1.0 - z) * n + z * h
        return hn, hn

    hT, ys = jax.lax.scan(step, h0, jnp.transpose(emb, (1, 0, 2)))
    dec = jnp.transpose(ys, (1, 0, 2))
    a = jnp.einsum("bsh,bth->bst", enc, dec)
    a = jax.nn.softmax(a, axis=1)
    c = jnp.einsum("bst,bsh->bth", a, enc)
    cat = jnp.concatenate([c, dec], axis=-1)
    out = jnp.tanh(cat @ params["watt"].T + params["batt"])
    logits = out @ params["wfc"].T + params["bfc"]
    return logits, hT[None]


if __name__ == "__main__":
    # small shapes: vocab V=16, emb E=8, hidden H=32 (mod=1), B=2, T=6, S=10
    V, E, HID, MOD = 16, 8, 32, 1
    B, T, S = 2, 6, 10

    key = jax.random.PRNGKey(0)
    kp, kt, kh, ke = jax.random.split(key, 4)

    params, H = init_decoder_params(kp, V, E, HID, MOD)
    prepped, vocab = prepare_decoder_params(params, H)   # one-time, outside jit

    token_seq = jax.random.randint(kt, (B, T), 0, V, dtype=jnp.int32)
    hidden_state = jax.random.normal(kh, (B, H), jnp.float32)
    enc_output = jax.random.normal(ke, (B, S, H), jnp.float32)

    logits, hidden = decoder_forward(prepped, token_seq, hidden_state,
                                     enc_output, vocab=vocab)
    jax.block_until_ready((logits, hidden))

    ref_logits, ref_hidden = decoder_reference(params, token_seq, hidden_state,
                                               enc_output)
    assert logits.shape == (B, T, V) and hidden.shape == (1, B, H)
    assert jnp.allclose(logits, ref_logits, atol=1e-3, rtol=1e-3)
    assert jnp.allclose(hidden, ref_hidden, atol=1e-4, rtol=1e-4)

    print("KERNEL_OK")
</pallas_src>

<mosaic_0001>
module attributes {stable_mosaic.version = 11 : i64} {
  func.func @_decoder_kernel(%arg0: i32, %arg1: memref<12x1xi32, #tpu.memory_space<vmem>>, %arg2: memref<2x32xf32, #tpu.memory_space<vmem>>, %arg3: memref<16x32xf32, #tpu.memory_space<vmem>>, %arg4: memref<16x32xf32, #tpu.memory_space<vmem>>, %arg5: memref<16x32xf32, #tpu.memory_space<vmem>>, %arg6: memref<32x32xf32, #tpu.memory_space<vmem>>, %arg7: memref<32x32xf32, #tpu.memory_space<vmem>>, %arg8: memref<32x32xf32, #tpu.memory_space<vmem>>, %arg9: memref<1x32xf32, #tpu.memory_space<vmem>>, %arg10: memref<1x32xf32, #tpu.memory_space<vmem>>, %arg11: memref<1x32xf32, #tpu.memory_space<vmem>>, %arg12: memref<2x10x32xf32, #tpu.memory_space<vmem>>, %arg13: memref<32x32xf32, #tpu.memory_space<vmem>>, %arg14: memref<32x32xf32, #tpu.memory_space<vmem>>, %arg15: memref<1x32xf32, #tpu.memory_space<vmem>>, %arg16: memref<32x128xf32, #tpu.memory_space<vmem>>, %arg17: memref<1x128xf32, #tpu.memory_space<vmem>>, %arg18: memref<12x128xf32, #tpu.memory_space<vmem>>, %arg19: memref<2x32xf32, #tpu.memory_space<vmem>>) attributes {dimension_semantics = [#tpu.dimension_semantics<arbitrary>], iteration_bounds = array<i64: 1>, scalar_prefetch = 0 : i64, scratch_operands = 0 : i64, tpu.core_type = #tpu.core_type<tc>, window_params = [{pipeline_mode = #tpu.pipeline_mode<synchronous>, transform_indices = @transform_0, window_bounds = array<i64: 12, 1>}, {pipeline_mode = #tpu.pipeline_mode<synchronous>, transform_indices = @transform_1, window_bounds = array<i64: 2, 32>}, {pipeline_mode = #tpu.pipeline_mode<synchronous>, transform_indices = @transform_2, window_bounds = array<i64: 16, 32>}, {pipeline_mode = #tpu.pipeline_mode<synchronous>, transform_indices = @transform_3, window_bounds = array<i64: 16, 32>}, {pipeline_mode = #tpu.pipeline_mode<synchronous>, transform_indices = @transform_4, window_bounds = array<i64: 16, 32>}, {pipeline_mode = #tpu.pipeline_mode<synchronous>, transform_indices = @transform_5, window_bounds = array<i64: 32, 32>}, {pipeline_mode = #tpu.pipeline_mode<synchronous>, transform_indices = @transform_6, window_bounds = array<i64: 32, 32>}, {pipeline_mode = #tpu.pipeline_mode<synchronous>, transform_indices = @transform_7, window_bounds = array<i64: 32, 32>}, {pipeline_mode = #tpu.pipeline_mode<synchronous>, transform_indices = @transform_8, window_bounds = array<i64: 1, 32>}, {pipeline_mode = #tpu.pipeline_mode<synchronous>, transform_indices = @transform_9, window_bounds = array<i64: 1, 32>}, {pipeline_mode = #tpu.pipeline_mode<synchronous>, transform_indices = @transform_10, window_bounds = array<i64: 1, 32>}, {pipeline_mode = #tpu.pipeline_mode<synchronous>, transform_indices = @transform_11, window_bounds = array<i64: 2, 10, 32>}, {pipeline_mode = #tpu.pipeline_mode<synchronous>, transform_indices = @transform_12, window_bounds = array<i64: 32, 32>}, {pipeline_mode = #tpu.pipeline_mode<synchronous>, transform_indices = @transform_13, window_bounds = array<i64: 32, 32>}, {pipeline_mode = #tpu.pipeline_mode<synchronous>, transform_indices = @transform_14, window_bounds = array<i64: 1, 32>}, {pipeline_mode = #tpu.pipeline_mode<synchronous>, transform_indices = @transform_15, window_bounds = array<i64: 32, 128>}, {pipeline_mode = #tpu.pipeline_mode<synchronous>, transform_indices = @transform_16, window_bounds = array<i64: 1, 128>}, {pipeline_mode = #tpu.pipeline_mode<synchronous>, transform_indices = @transform_17, window_bounds = array<i64: 12, 128>}, {pipeline_mode = #tpu.pipeline_mode<synchronous>, transform_indices = @transform_18, window_bounds = array<i64: 2, 32>}]} {
    %c0 = arith.constant 0 : index
    %c0_0 = arith.constant 0 : index
    %0 = vector.load %arg1[%c0, %c0_0] : memref<12x1xi32, #tpu.memory_space<vmem>>, vector<12x1xi32>
    %1 = tpu.iota {dimensions = array<i32: 1>} : vector<12x16xi32>
    %2 = vector.broadcast %0 : vector<12x1xi32> to vector<12x16xi32>
    %3 = arith.cmpi eq, %2, %1 : vector<12x16xi32>
    %cst = arith.constant 1.000000e+00 : f32
    %cst_1 = arith.constant 0.000000e+00 : f32
    %4 = vector.broadcast %cst : f32 to vector<12x16xf32>
    %5 = vector.broadcast %cst_1 : f32 to vector<12x16xf32>
    %6 = arith.select %3, %4, %5 : vector<12x16xi1>, vector<12x16xf32>
    %c0_2 = arith.constant 0 : index
    %c0_3 = arith.constant 0 : index
    %7 = vector.load %arg3[%c0_2, %c0_3] : memref<16x32xf32, #tpu.memory_space<vmem>>, vector<16x32xf32>
    %cst_4 = arith.constant dense<0.000000e+00> : vector<12x32xf32>
    %8 = tpu.matmul %6, %7, %cst_4 {dimension_numbers = #tpu.dot_dimension_numbers<[1], [0], [0], [1], [0, 0, 1, 1], [], []>} : vector<12x16xf32>, vector<16x32xf32>, vector<12x32xf32> -> vector<12x32xf32>
    %c0_5 = arith.constant 0 : index
    %c0_6 = arith.constant 0 : index
    %9 = vector.load %arg4[%c0_5, %c0_6] : memref<16x32xf32, #tpu.memory_space<vmem>>, vector<16x32xf32>
    %cst_7 = arith.constant dense<0.000000e+00> : vector<12x32xf32>
    %10 = tpu.matmul %6, %9, %cst_7 {dimension_numbers = #tpu.dot_dimension_numbers<[1], [0], [0], [1], [0, 0, 1, 1], [], []>} : vector<12x16xf32>, vector<16x32xf32>, vector<12x32xf32> -> vector<12x32xf32>
    %c0_8 = arith.constant 0 : index
    %c0_9 = arith.constant 0 : index
    %11 = vector.load %arg5[%c0_8, %c0_9] : memref<16x32xf32, #tpu.memory_space<vmem>>, vector<16x32xf32>
    %cst_10 = arith.constant dense<0.000000e+00> : vector<12x32xf32>
    %12 = tpu.matmul %6, %11, %cst_10 {dimension_numbers = #tpu.dot_dimension_numbers<[1], [0], [0], [1], [0, 0, 1, 1], [], []>} : vector<12x16xf32>, vector<16x32xf32>, vector<12x32xf32> -> vector<12x32xf32>
    %c0_11 = arith.constant 0 : index
    %c0_12 = arith.constant 0 : index
    %13 = vector.load %arg6[%c0_11, %c0_12] : memref<32x32xf32, #tpu.memory_space<vmem>>, vector<32x32xf32>
    %c0_13 = arith.constant 0 : index
    %c0_14 = arith.constant 0 : index
    %14 = vector.load %arg7[%c0_13, %c0_14] : memref<32x32xf32, #tpu.memory_space<vmem>>, vector<32x32xf32>
    %c0_15 = arith.constant 0 : index
    %c0_16 = arith.constant 0 : index
    %15 = vector.load %arg8[%c0_15, %c0_16] : memref<32x32xf32, #tpu.memory_space<vmem>>, vector<32x32xf32>
    %c0_17 = arith.constant 0 : index
    %c0_18 = arith.constant 0 : index
    %16 = vector.load %arg9[%c0_17, %c0_18] : memref<1x32xf32, #tpu.memory_space<vmem>>, vector<1x32xf32>
    %c0_19 = arith.constant 0 : index
    %c0_20 = arith.constant 0 : index
    %17 = vector.load %arg10[%c0_19, %c0_20] : memref<1x32xf32, #tpu.memory_space<vmem>>, vector<1x32xf32>
    %c0_21 = arith.constant 0 : index
    %c0_22 = arith.constant 0 : index
    %18 = vector.load %arg11[%c0_21, %c0_22] : memref<1x32xf32, #tpu.memory_space<vmem>>, vector<1x32xf32>
    %c0_23 = arith.constant 0 : index
    %c0_24 = arith.constant 0 : index
    %19 = vector.load %arg2[%c0_23, %c0_24] : memref<2x32xf32, #tpu.memory_space<vmem>>, vector<2x32xf32>
    %cst_25 = arith.constant dense<0.000000e+00> : vector<2x32xf32>
    %20 = tpu.matmul %19, %13, %cst_25 {dimension_numbers = #tpu.dot_dimension_numbers<[1], [0], [0], [1], [0, 0, 1, 1], [], []>} : vector<2x32xf32>, vector<32x32xf32>, vector<2x32xf32> -> vector<2x32xf32>
    %21 = vector.broadcast %16 : vector<1x32xf32> to vector<2x32xf32>
    %22 = arith.addf %20, %21 : vector<2x32xf32>
    %cst_26 = arith.constant dense<0.000000e+00> : vector<2x32xf32>
    %23 = tpu.matmul %19, %14, %cst_26 {dimension_numbers = #tpu.dot_dimension_numbers<[1], [0], [0], [1], [0, 0, 1, 1], [], []>} : vector<2x32xf32>, vector<32x32xf32>, vector<2x32xf32> -> vector<2x32xf32>
    %24 = vector.broadcast %17 : vector<1x32xf32> to vector<2x32xf32>
    %25 = arith.addf %23, %24 : vector<2x32xf32>
    %cst_27 = arith.constant dense<0.000000e+00> : vector<2x32xf32>
    %26 = tpu.matmul %19, %15, %cst_27 {dimension_numbers = #tpu.dot_dimension_numbers<[1], [0], [0], [1], [0, 0, 1, 1], [], []>} : vector<2x32xf32>, vector<32x32xf32>, vector<2x32xf32> -> vector<2x32xf32>
    %27 = vector.broadcast %18 : vector<1x32xf32> to vector<2x32xf32>
    %28 = arith.addf %26, %27 : vector<2x32xf32>
    %29 = vector.extract_strided_slice %8 {offsets = [0, 0], sizes = [2, 32], strides = [1, 1]} : vector<12x32xf32> to vector<2x32xf32>
    %30 = arith.addf %29, %22 : vector<2x32xf32>
    %31 = arith.negf %30 : vector<2x32xf32>
    %32 = math.exp %31 : vector<2x32xf32>
    %cst_28 = arith.constant 1.000000e+00 : f32
    %33 = vector.broadcast %cst_28 : f32 to vector<2x32xf32>
    %34 = arith.addf %33, %32 : vector<2x32xf32>
    %35 = arith.divf %33, %34 : vector<2x32xf32>
    %36 = vector.extract_strided_slice %10 {offsets = [0, 0], sizes = [2, 32], strides = [1, 1]} : vector<12x32xf32> to vector<2x32xf32>
    %37 = arith.addf %36, %25 : vector<2x32xf32>
    %38 = arith.negf %37 : vector<2x32xf32>
    %39 = math.exp %38 : vector<2x32xf32>
    %cst_29 = arith.constant 1.000000e+00 : f32
    %40 = vector.broadcast %cst_29 : f32 to vector<2x32xf32>
    %41 = arith.addf %40, %39 : vector<2x32xf32>
    %42 = arith.divf %40, %41 : vector<2x32xf32>
    %43 = vector.extract_strided_slice %12 {offsets = [0, 0], sizes = [2, 32], strides = [1, 1]} : vector<12x32xf32> to vector<2x32xf32>
    %44 = arith.mulf %35, %28 : vector<2x32xf32>
    %45 = arith.addf %43, %44 : vector<2x32xf32>
    %46 = math.tanh %45 : vector<2x32xf32>
    %cst_30 = arith.constant 1.000000e+00 : f32
    %47 = vector.broadcast %cst_30 : f32 to vector<2x32xf32>
    %48 = arith.subf %47, %42 : vector<2x32xf32>
    %49 = arith.mulf %48, %46 : vector<2x32xf32>
    %50 = arith.mulf %42, %19 : vector<2x32xf32>
    %51 = arith.addf %49, %50 : vector<2x32xf32>
    %cst_31 = arith.constant dense<0.000000e+00> : vector<2x32xf32>
    %52 = tpu.matmul %51, %13, %cst_31 {dimension_numbers = #tpu.dot_dimension_numbers<[1], [0], [0], [1], [0, 0, 1, 1], [], []>} : vector<2x32xf32>, vector<32x32xf32>, vector<2x32xf32> -> vector<2x32xf32>
    %53 = vector.broadcast %16 : vector<1x32xf32> to vector<2x32xf32>
    %54 = arith.addf %52, %53 : vector<2x32xf32>
    %cst_32 = arith.constant dense<0.000000e+00> : vector<2x32xf32>
    %55 = tpu.matmul %51, %14, %cst_32 {dimension_numbers = #tpu.dot_dimension_numbers<[1], [0], [0], [1], [0, 0, 1, 1], [], []>} : vector<2x32xf32>, vector<32x32xf32>, vector<2x32xf32> -> vector<2x32xf32>
    %56 = vector.broadcast %17 : vector<1x32xf32> to vector<2x32xf32>
    %57 = arith.addf %55, %56 : vector<2x32xf32>
    %cst_33 = arith.constant dense<0.000000e+00> : vector<2x32xf32>
    %58 = tpu.matmul %51, %15, %cst_33 {dimension_numbers = #tpu.dot_dimension_numbers<[1], [0], [0], [1], [0, 0, 1, 1], [], []>} : vector<2x32xf32>, vector<32x32xf32>, vector<2x32xf32> -> vector<2x32xf32>
    %59 = vector.broadcast %18 : vector<1x32xf32> to vector<2x32xf32>
    %60 = arith.addf %58, %59 : vector<2x32xf32>
    %61 = vector.extract_strided_slice %8 {offsets = [2, 0], sizes = [2, 32], strides = [1, 1]} : vector<12x32xf32> to vector<2x32xf32>
    %62 = arith.addf %61, %54 : vector<2x32xf32>
    %63 = arith.negf %62 : vector<2x32xf32>
    %64 = math.exp %63 : vector<2x32xf32>
    %cst_34 = arith.constant 1.000000e+00 : f32
    %65 = vector.broadcast %cst_34 : f32 to vector<2x32xf32>
    %66 = arith.addf %65, %64 : vector<2x32xf32>
    %67 = arith.divf %65, %66 : vector<2x32xf32>
    %68 = vector.extract_strided_slice %10 {offsets = [2, 0], sizes = [2, 32], strides = [1, 1]} : vector<12x32xf32> to vector<2x32xf32>
    %69 = arith.addf %68, %57 : vector<2x32xf32>
    %70 = arith.negf %69 : vector<2x32xf32>
    %71 = math.exp %70 : vector<2x32xf32>
    %cst_35 = arith.constant 1.000000e+00 : f32
    %72 = vector.broadcast %cst_35 : f32 to vector<2x32xf32>
    %73 = arith.addf %72, %71 : vector<2x32xf32>
    %74 = arith.divf %72, %73 : vector<2x32xf32>
    %75 = vector.extract_strided_slice %12 {offsets = [2, 0], sizes = [2, 32], strides = [1, 1]} : vector<12x32xf32> to vector<2x32xf32>
    %76 = arith.mulf %67, %60 : vector<2x32xf32>
    %77 = arith.addf %75, %76 : vector<2x32xf32>
    %78 = math.tanh %77 : vector<2x32xf32>
    %cst_36 = arith.constant 1.000000e+00 : f32
    %79 = vector.broadcast %cst_36 : f32 to vector<2x32xf32>
    %80 = arith.subf %79, %74 : vector<2x32xf32>
    %81 = arith.mulf %80, %78 : vector<2x32xf32>
    %82 = arith.mulf %74, %51 : vector<2x32xf32>
    %83 = arith.addf %81, %82 : vector<2x32xf32>
    %cst_37 = arith.constant dense<0.000000e+00> : vector<2x32xf32>
    %84 = tpu.matmul %83, %13, %cst_37 {dimension_numbers = #tpu.dot_dimension_numbers<[1], [0], [0], [1], [0, 0, 1, 1], [], []>} : vector<2x32xf32>, vector<32x32xf32>, vector<2x32xf32> -> vector<2x32xf32>
    %85 = vector.broadcast %16 : vector<1x32xf32> to vector<2x32xf32>
    %86 = arith.addf %84, %85 : vector<2x32xf32>
    %cst_38 = arith.constant dense<0.000000e+00> : vector<2x32xf32>
    %87 = tpu.matmul %83, %14, %cst_38 {dimension_numbers = #tpu.dot_dimension_numbers<[1], [0], [0], [1], [0, 0, 1, 1], [], []>} : vector<2x32xf32>, vector<32x32xf32>, vector<2x32xf32> -> vector<2x32xf32>
    %88 = vector.broadcast %17 : vector<1x32xf32> to vector<2x32xf32>
    %89 = arith.addf %87, %88 : vector<2x32xf32>
    %cst_39 = arith.constant dense<0.000000e+00> : vector<2x32xf32>
    %90 = tpu.matmul %83, %15, %cst_39 {dimension_numbers = #tpu.dot_dimension_numbers<[1], [0], [0], [1], [0, 0, 1, 1], [], []>} : vector<2x32xf32>, vector<32x32xf32>, vector<2x32xf32> -> vector<2x32xf32>
    %91 = vector.broadcast %18 : vector<1x32xf32> to vector<2x32xf32>
    %92 = arith.addf %90, %91 : vector<2x32xf32>
    %93 = vector.extract_strided_slice %8 {offsets = [4, 0], sizes = [2, 32], strides = [1, 1]} : vector<12x32xf32> to vector<2x32xf32>
    %94 = arith.addf %93, %86 : vector<2x32xf32>
    %95 = arith.negf %94 : vector<2x32xf32>
    %96 = math.exp %95 : vector<2x32xf32>
    %cst_40 = arith.constant 1.000000e+00 : f32
    %97 = vector.broadcast %cst_40 : f32 to vector<2x32xf32>
    %98 = arith.addf %97, %96 : vector<2x32xf32>
    %99 = arith.divf %97, %98 : vector<2x32xf32>
    %100 = vector.extract_strided_slice %10 {offsets = [4, 0], sizes = [2, 32], strides = [1, 1]} : vector<12x32xf32> to vector<2x32xf32>
    %101 = arith.addf %100, %89 : vector<2x32xf32>
    %102 = arith.negf %101 : vector<2x32xf32>
    %103 = math.exp %102 : vector<2x32xf32>
    %cst_41 = arith.constant 1.000000e+00 : f32
    %104 = vector.broadcast %cst_41 : f32 to vector<2x32xf32>
    %105 = arith.addf %104, %103 : vector<2x32xf32>
    %106 = arith.divf %104, %105 : vector<2x32xf32>
    %107 = vector.extract_strided_slice %12 {offsets = [4, 0], sizes = [2, 32], strides = [1, 1]} : vector<12x32xf32> to vector<2x32xf32>
    %108 = arith.mulf %99, %92 : vector<2x32xf32>
    %109 = arith.addf %107, %108 : vector<2x32xf32>
    %110 = math.tanh %109 : vector<2x32xf32>
    %cst_42 = arith.constant 1.000000e+00 : f32
    %111 = vector.broadcast %cst_42 : f32 to vector<2x32xf32>
    %112 = arith.subf %111, %106 : vector<2x32xf32>
    %113 = arith.mulf %112, %110 : vector<2x32xf32>
    %114 = arith.mulf %106, %83 : vector<2x32xf32>
    %115 = arith.addf %113, %114 : vector<2x32xf32>
    %cst_43 = arith.constant dense<0.000000e+00> : vector<2x32xf32>
    %116 = tpu.matmul %115, %13, %cst_43 {dimension_numbers = #tpu.dot_dimension_numbers<[1], [0], [0], [1], [0, 0, 1, 1], [], []>} : vector<2x32xf32>, vector<32x32xf32>, vector<2x32xf32> -> vector<2x32xf32>
    %117 = vector.broadcast %16 : vector<1x32xf32> to vector<2x32xf32>
    %118 = arith.addf %116, %117 : vector<2x32xf32>
    %cst_44 = arith.constant dense<0.000000e+00> : vector<2x32xf32>
    %119 = tpu.matmul %115, %14, %cst_44 {dimension_numbers = #tpu.dot_dimension_numbers<[1], [0], [0], [1], [0, 0, 1, 1], [], []>} : vector<2x32xf32>, vector<32x32xf32>, vector<2x32xf32> -> vector<2x32xf32>
    %120 = vector.broadcast %17 : vector<1x32xf32> to vector<2x32xf32>
    %121 = arith.addf %119, %120 : vector<2x32xf32>
    %cst_45 = arith.constant dense<0.000000e+00> : vector<2x32xf32>
    %122 = tpu.matmul %115, %15, %cst_45 {dimension_numbers = #tpu.dot_dimension_numbers<[1], [0], [0], [1], [0, 0, 1, 1], [], []>} : vector<2x32xf32>, vector<32x32xf32>, vector<2x32xf32> -> vector<2x32xf32>
    %123 = vector.broadcast %18 : vector<1x32xf32> to vector<2x32xf32>
    %124 = arith.addf %122, %123 : vector<2x32xf32>
    %125 = vector.extract_strided_slice %8 {offsets = [6, 0], sizes = [2, 32], strides = [1, 1]} : vector<12x32xf32> to vector<2x32xf32>
    %126 = arith.addf %125, %118 : vector<2x32xf32>
    %127 = arith.negf %126 : vector<2x32xf32>
    %128 = math.exp %127 : vector<2x32xf32>
    %cst_46 = arith.constant 1.000000e+00 : f32
    %129 = vector.broadcast %cst_46 : f32 to vector<2x32xf32>
    %130 = arith.addf %129, %128 : vector<2x32xf32>
    %131 = arith.divf %129, %130 : vector<2x32xf32>
    %132 = vector.extract_strided_slice %10 {offsets = [6, 0], sizes = [2, 32], strides = [1, 1]} : vector<12x32xf32> to vector<2x32xf32>
    %133 = arith.addf %132, %121 : vector<2x32xf32>
    %134 = arith.negf %133 : vector<2x32xf32>
    %135 = math.exp %134 : vector<2x32xf32>
    %cst_47 = arith.constant 1.000000e+00 : f32
    %136 = vector.broadcast %cst_47 : f32 to vector<2x32xf32>
    %137 = arith.addf %136, %135 : vector<2x32xf32>
    %138 = arith.divf %136, %137 : vector<2x32xf32>
    %139 = vector.extract_strided_slice %12 {offsets = [6, 0], sizes = [2, 32], strides = [1, 1]} : vector<12x32xf32> to vector<2x32xf32>
    %140 = arith.mulf %131, %124 : vector<2x32xf32>
    %141 = arith.addf %139, %140 : vector<2x32xf32>
    %142 = math.tanh %141 : vector<2x32xf32>
    %cst_48 = arith.constant 1.000000e+00 : f32
    %143 = vector.broadcast %cst_48 : f32 to vector<2x32xf32>
    %144 = arith.subf %143, %138 : vector<2x32xf32>
    %145 = arith.mulf %144, %142 : vector<2x32xf32>
    %146 = arith.mulf %138, %115 : vector<2x32xf32>
    %147 = arith.addf %145, %146 : vector<2x32xf32>
    %cst_49 = arith.constant dense<0.000000e+00> : vector<2x32xf32>
    %148 = tpu.matmul %147, %13, %cst_49 {dimension_numbers = #tpu.dot_dimension_numbers<[1], [0], [0], [1], [0, 0, 1, 1], [], []>} : vector<2x32xf32>, vector<32x32xf32>, vector<2x32xf32> -> vector<2x32xf32>
    %149 = vector.broadcast %16 : vector<1x32xf32> to vector<2x32xf32>
    %150 = arith.addf %148, %149 : vector<2x32xf32>
    %cst_50 = arith.constant dense<0.000000e+00> : vector<2x32xf32>
    %151 = tpu.matmul %147, %14, %cst_50 {dimension_numbers = #tpu.dot_dimension_numbers<[1], [0], [0], [1], [0, 0, 1, 1], [], []>} : vector<2x32xf32>, vector<32x32xf32>, vector<2x32xf32> -> vector<2x32xf32>
    %152 = vector.broadcast %17 : vector<1x32xf32> to vector<2x32xf32>
    %153 = arith.addf %151, %152 : vector<2x32xf32>
    %cst_51 = arith.constant dense<0.000000e+00> : vector<2x32xf32>
    %154 = tpu.matmul %147, %15, %cst_51 {dimension_numbers = #tpu.dot_dimension_numbers<[1], [0], [0], [1], [0, 0, 1, 1], [], []>} : vector<2x32xf32>, vector<32x32xf32>, vector<2x32xf32> -> vector<2x32xf32>
    %155 = vector.broadcast %18 : vector<1x32xf32> to vector<2x32xf32>
    %156 = arith.addf %154, %155 : vector<2x32xf32>
    %157 = vector.extract_strided_slice %8 {offsets = [8, 0], sizes = [2, 32], strides = [1, 1]} : vector<12x32xf32> to vector<2x32xf32>
    %158 = arith.addf %157, %150 : vector<2x32xf32>
    %159 = arith.negf %158 : vector<2x32xf32>
    %160 = math.exp %159 : vector<2x32xf32>
    %cst_52 = arith.constant 1.000000e+00 : f32
    %161 = vector.broadcast %cst_52 : f32 to vector<2x32xf32>
    %162 = arith.addf %161, %160 : vector<2x32xf32>
    %163 = arith.divf %161, %162 : vector<2x32xf32>
    %164 = vector.extract_strided_slice %10 {offsets = [8, 0], sizes = [2, 32], strides = [1, 1]} : vector<12x32xf32> to vector<2x32xf32>
    %165 = arith.addf %164, %153 : vector<2x32xf32>
    %166 = arith.negf %165 : vector<2x32xf32>
    %167 = math.exp %166 : vector<2x32xf32>
    %cst_53 = arith.constant 1.000000e+00 : f32
    %168 = vector.broadcast %cst_53 : f32 to vector<2x32xf32>
    %169 = arith.addf %168, %167 : vector<2x32xf32>
    %170 = arith.divf %168, %169 : vector<2x32xf32>
    %171 = vector.extract_strided_slice %12 {offsets = [8, 0], sizes = [2, 32], strides = [1, 1]} : vector<12x32xf32> to vector<2x32xf32>
    %172 = arith.mulf %163, %156 : vector<2x32xf32>
    %173 = arith.addf %171, %172 : vector<2x32xf32>
    %174 = math.tanh %173 : vector<2x32xf32>
    %cst_54 = arith.constant 1.000000e+00 : f32
    %175 = vector.broadcast %cst_54 : f32 to vector<2x32xf32>
    %176 = arith.subf %175, %170 : vector<2x32xf32>
    %177 = arith.mulf %176, %174 : vector<2x32xf32>
    %178 = arith.mulf %170, %147 : vector<2x32xf32>
    %179 = arith.addf %177, %178 : vector<2x32xf32>
    %cst_55 = arith.constant dense<0.000000e+00> : vector<2x32xf32>
    %180 = tpu.matmul %179, %13, %cst_55 {dimension_numbers = #tpu.dot_dimension_numbers<[1], [0], [0], [1], [0, 0, 1, 1], [], []>} : vector<2x32xf32>, vector<32x32xf32>, vector<2x32xf32> -> vector<2x32xf32>
    %181 = vector.broadcast %16 : vector<1x32xf32> to vector<2x32xf32>
    %182 = arith.addf %180, %181 : vector<2x32xf32>
    %cst_56 = arith.constant dense<0.000000e+00> : vector<2x32xf32>
    %183 = tpu.matmul %179, %14, %cst_56 {dimension_numbers = #tpu.dot_dimension_numbers<[1], [0], [0], [1], [0, 0, 1, 1], [], []>} : vector<2x32xf32>, vector<32x32xf32>, vector<2x32xf32> -> vector<2x32xf32>
    %184 = vector.broadcast %17 : vector<1x32xf32> to vector<2x32xf32>
    %185 = arith.addf %183, %184 : vector<2x32xf32>
    %cst_57 = arith.constant dense<0.000000e+00> : vector<2x32xf32>
    %186 = tpu.matmul %179, %15, %cst_57 {dimension_numbers = #tpu.dot_dimension_numbers<[1], [0], [0], [1], [0, 0, 1, 1], [], []>} : vector<2x32xf32>, vector<32x32xf32>, vector<2x32xf32> -> vector<2x32xf32>
    %187 = vector.broadcast %18 : vector<1x32xf32> to vector<2x32xf32>
    %188 = arith.addf %186, %187 : vector<2x32xf32>
    %189 = vector.extract_strided_slice %8 {offsets = [10, 0], sizes = [2, 32], strides = [1, 1]} : vector<12x32xf32> to vector<2x32xf32>
    %190 = arith.addf %189, %182 : vector<2x32xf32>
    %191 = arith.negf %190 : vector<2x32xf32>
    %192 = math.exp %191 : vector<2x32xf32>
    %cst_58 = arith.constant 1.000000e+00 : f32
    %193 = vector.broadcast %cst_58 : f32 to vector<2x32xf32>
    %194 = arith.addf %193, %192 : vector<2x32xf32>
    %195 = arith.divf %193, %194 : vector<2x32xf32>
    %196 = vector.extract_strided_slice %10 {offsets = [10, 0], sizes = [2, 32], strides = [1, 1]} : vector<12x32xf32> to vector<2x32xf32>
    %197 = arith.addf %196, %185 : vector<2x32xf32>
    %198 = arith.negf %197 : vector<2x32xf32>
    %199 = math.exp %198 : vector<2x32xf32>
    %cst_59 = arith.constant 1.000000e+00 : f32
    %200 = vector.broadcast %cst_59 : f32 to vector<2x32xf32>
    %201 = arith.addf %200, %199 : vector<2x32xf32>
    %202 = arith.divf %200, %201 : vector<2x32xf32>
    %203 = vector.extract_strided_slice %12 {offsets = [10, 0], sizes = [2, 32], strides = [1, 1]} : vector<12x32xf32> to vector<2x32xf32>
    %204 = arith.mulf %195, %188 : vector<2x32xf32>
    %205 = arith.addf %203, %204 : vector<2x32xf32>
    %206 = math.tanh %205 : vector<2x32xf32>
    %cst_60 = arith.constant 1.000000e+00 : f32
    %207 = vector.broadcast %cst_60 : f32 to vector<2x32xf32>
    %208 = arith.subf %207, %202 : vector<2x32xf32>
    %209 = arith.mulf %208, %206 : vector<2x32xf32>
    %210 = arith.mulf %202, %179 : vector<2x32xf32>
    %211 = arith.addf %209, %210 : vector<2x32xf32>
    %c0_61 = arith.constant 0 : index
    %c0_62 = arith.constant 0 : index
    %212 = vector.load %arg19[%c0_61, %c0_62] : memref<2x32xf32, #tpu.memory_space<vmem>>, vector<2x32xf32>
    tpu.vector_store %arg19[%c0_61, %c0_62], %211 {strides = array<i32>} : memref<2x32xf32, #tpu.memory_space<vmem>>, vector<2x32xf32>,
    %c0_63 = arith.constant 0 : index
    %c0_64 = arith.constant 0 : index
    %213 = vector.load %arg13[%c0_63, %c0_64] : memref<32x32xf32, #tpu.memory_space<vmem>>, vector<32x32xf32>
    %c0_65 = arith.constant 0 : index
    %c0_66 = arith.constant 0 : index
    %214 = vector.load %arg14[%c0_65, %c0_66] : memref<32x32xf32, #tpu.memory_space<vmem>>, vector<32x32xf32>
    %c0_67 = arith.constant 0 : index
    %c0_68 = arith.constant 0 : index
    %215 = vector.load %arg15[%c0_67, %c0_68] : memref<1x32xf32, #tpu.memory_space<vmem>>, vector<1x32xf32>
    %c0_69 = arith.constant 0 : index
    %c0_70 = arith.constant 0 : index
    %216 = vector.load %arg16[%c0_69, %c0_70] : memref<32x128xf32, #tpu.memory_space<vmem>>, vector<32x128xf32>
    %c0_71 = arith.constant 0 : index
    %c0_72 = arith.constant 0 : index
    %217 = vector.load %arg17[%c0_71, %c0_72] : memref<1x128xf32, #tpu.memory_space<vmem>>, vector<1x128xf32>
    %218 = vector.extract_strided_slice %51 {offsets = [0, 0], sizes = [1, 32], strides = [1, 1]} : vector<2x32xf32> to vector<1x32xf32>
    %219 = vector.extract_strided_slice %83 {offsets = [0, 0], sizes = [1, 32], strides = [1, 1]} : vector<2x32xf32> to vector<1x32xf32>
    %220 = vector.extract_strided_slice %115 {offsets = [0, 0], sizes = [1, 32], strides = [1, 1]} : vector<2x32xf32> to vector<1x32xf32>
    %221 = vector.extract_strided_slice %147 {offsets = [0, 0], sizes = [1, 32], strides = [1, 1]} : vector<2x32xf32> to vector<1x32xf32>
    %222 = vector.extract_strided_slice %179 {offsets = [0, 0], sizes = [1, 32], strides = [1, 1]} : vector<2x32xf32> to vector<1x32xf32>
    %223 = vector.extract_strided_slice %211 {offsets = [0, 0], sizes = [1, 32], strides = [1, 1]} : vector<2x32xf32> to vector<1x32xf32>
    %224 = tpu.concatenate %218, %219, %220, %221, %222, %223 in 0 : vector<1x32xf32>, vector<1x32xf32>, vector<1x32xf32>, vector<1x32xf32>, vector<1x32xf32>, vector<1x32xf32> -> vector<6x32xf32>
    %c0_73 = arith.constant 0 : index
    %c0_74 = arith.constant 0 : index
    %c0_75 = arith.constant 0 : index
    %225 = vector.load %arg12[%c0_73, %c0_74, %c0_75] : memref<2x10x32xf32, #tpu.memory_space<vmem>>, vector<1x10x32xf32>
    %226 = vector.shape_cast %225 : vector<1x10x32xf32> to vector<10x32xf32>
    %cst_76 = arith.constant dense<0.000000e+00> : vector<6x10xf32>
    %227 = tpu.matmul %224, %226, %cst_76 {dimension_numbers = #tpu.dot_dimension_numbers<[1], [1], [0], [0], [0, 0, 1, 0], [], []>} : vector<6x32xf32>, vector<10x32xf32>, vector<6x10xf32> -> vector<6x10xf32>
    %cst_77 = arith.constant dense<0xFF800000> : vector<6xf32>
    %228 = vector.multi_reduction <maximumf>, %227, %cst_77 [1] : vector<6x10xf32> to vector<6xf32>
    %229 = vector.shape_cast %228 : vector<6xf32> to vector<6x1xf32>
    %230 = vector.broadcast %229 : vector<6x1xf32> to vector<6x10xf32>
    %231 = arith.subf %227, %230 : vector<6x10xf32>
    %232 = math.exp %231 : vector<6x10xf32>
    %cst_78 = arith.constant dense<0.000000e+00> : vector<6xf32>
    %233 = vector.multi_reduction <add>, %232, %cst_78 [1] : vector<6x10xf32> to vector<6xf32>
    %234 = vector.shape_cast %233 : vector<6xf32> to vector<6x1xf32>
    %235 = vector.broadcast %234 : vector<6x1xf32> to vector<6x10xf32>
    %236 = arith.divf %232, %235 : vector<6x10xf32>
    %cst_79 = arith.constant dense<0.000000e+00> : vector<6x32xf32>
    %237 = tpu.matmul %236, %226, %cst_79 {dimension_numbers = #tpu.dot_dimension_numbers<[1], [0], [0], [1], [0, 0, 1, 1], [], []>} : vector<6x10xf32>, vector<10x32xf32>, vector<6x32xf32> -> vector<6x32xf32>
    %cst_80 = arith.constant dense<0.000000e+00> : vector<6x32xf32>
    %238 = tpu.matmul %237, %213, %cst_80 {dimension_numbers = #tpu.dot_dimension_numbers<[1], [0], [0], [1], [0, 0, 1, 1], [], []>} : vector<6x32xf32>, vector<32x32xf32>, vector<6x32xf32> -> vector<6x32xf32>
    %cst_81 = arith.constant dense<0.000000e+00> : vector<6x32xf32>
    %239 = tpu.matmul %224, %214, %cst_81 {dimension_numbers = #tpu.dot_dimension_numbers<[1], [0], [0], [1], [0, 0, 1, 1], [], []>} : vector<6x32xf32>, vector<32x32xf32>, vector<6x32xf32> -> vector<6x32xf32>
    %240 = arith.addf %238, %239 : vector<6x32xf32>
    %241 = vector.broadcast %215 : vector<1x32xf32> to vector<6x32xf32>
    %242 = arith.addf %240, %241 : vector<6x32xf32>
    %243 = math.tanh %242 : vector<6x32xf32>
    %cst_82 = arith.constant dense<0.000000e+00> : vector<6x128xf32>
    %244 = tpu.matmul %243, %216, %cst_82 {dimension_numbers = #tpu.dot_dimension_numbers<[1], [0], [0], [1], [0, 0, 1, 1], [], []>} : vector<6x32xf32>, vector<32x128xf32>, vector<6x128xf32> -> vector<6x128xf32>
    %245 = vector.broadcast %217 : vector<1x128xf32> to vector<6x128xf32>
    %246 = arith.addf %244, %245 : vector<6x128xf32>
    %247 = vector.extract_strided_slice %51 {offsets = [1, 0], sizes = [1, 32], strides = [1, 1]} : vector<2x32xf32> to vector<1x32xf32>
    %248 = vector.extract_strided_slice %83 {offsets = [1, 0], sizes = [1, 32], strides = [1, 1]} : vector<2x32xf32> to vector<1x32xf32>
    %249 = vector.extract_strided_slice %115 {offsets = [1, 0], sizes = [1, 32], strides = [1, 1]} : vector<2x32xf32> to vector<1x32xf32>
    %250 = vector.extract_strided_slice %147 {offsets = [1, 0], sizes = [1, 32], strides = [1, 1]} : vector<2x32xf32> to vector<1x32xf32>
    %251 = vector.extract_strided_slice %179 {offsets = [1, 0], sizes = [1, 32], strides = [1, 1]} : vector<2x32xf32> to vector<1x32xf32>
    %252 = vector.extract_strided_slice %211 {offsets = [1, 0], sizes = [1, 32], strides = [1, 1]} : vector<2x32xf32> to vector<1x32xf32>
    %253 = tpu.concatenate %247, %248, %249, %250, %251, %252 in 0 : vector<1x32xf32>, vector<1x32xf32>, vector<1x32xf32>, vector<1x32xf32>, vector<1x32xf32>, vector<1x32xf32> -> vector<6x32xf32>
    %c1 = arith.constant 1 : index
    %c0_83 = arith.constant 0 : index
    %c0_84 = arith.constant 0 : index
    %254 = vector.load %arg12[%c1, %c0_83, %c0_84] : memref<2x10x32xf32, #tpu.memory_space<vmem>>, vector<1x10x32xf32>
    %255 = vector.shape_cast %254 : vector<1x10x32xf32> to vector<10x32xf32>
    %cst_85 = arith.constant dense<0.000000e+00> : vector<6x10xf32>
    %256 = tpu.matmul %253, %255, %cst_85 {dimension_numbers = #tpu.dot_dimension_numbers<[1], [1], [0], [0], [0, 0, 1, 0], [], []>} : vector<6x32xf32>, vector<10x32xf32>, vector<6x10xf32> -> vector<6x10xf32>
    %cst_86 = arith.constant dense<0xFF800000> : vector<6xf32>
    %257 = vector.multi_reduction <maximumf>, %256, %cst_86 [1] : vector<6x10xf32> to vector<6xf32>
    %258 = vector.shape_cast %257 : vector<6xf32> to vector<6x1xf32>
    %259 = vector.broadcast %258 : vector<6x1xf32> to vector<6x10xf32>
    %260 = arith.subf %256, %259 : vector<6x10xf32>
    %261 = math.exp %260 : vector<6x10xf32>
    %cst_87 = arith.constant dense<0.000000e+00> : vector<6xf32>
    %262 = vector.multi_reduction <add>, %261, %cst_87 [1] : vector<6x10xf32> to vector<6xf32>
    %263 = vector.shape_cast %262 : vector<6xf32> to vector<6x1xf32>
    %264 = vector.broadcast %263 : vector<6x1xf32> to vector<6x10xf32>
    %265 = arith.divf %261, %264 : vector<6x10xf32>
    %cst_88 = arith.constant dense<0.000000e+00> : vector<6x32xf32>
    %266 = tpu.matmul %265, %255, %cst_88 {dimension_numbers = #tpu.dot_dimension_numbers<[1], [0], [0], [1], [0, 0, 1, 1], [], []>} : vector<6x10xf32>, vector<10x32xf32>, vector<6x32xf32> -> vector<6x32xf32>
    %cst_89 = arith.constant dense<0.000000e+00> : vector<6x32xf32>
    %267 = tpu.matmul %266, %213, %cst_89 {dimension_numbers = #tpu.dot_dimension_numbers<[1], [0], [0], [1], [0, 0, 1, 1], [], []>} : vector<6x32xf32>, vector<32x32xf32>, vector<6x32xf32> -> vector<6x32xf32>
    %cst_90 = arith.constant dense<0.000000e+00> : vector<6x32xf32>
    %268 = tpu.matmul %253, %214, %cst_90 {dimension_numbers = #tpu.dot_dimension_numbers<[1], [0], [0], [1], [0, 0, 1, 1], [], []>} : vector<6x32xf32>, vector<32x32xf32>, vector<6x32xf32> -> vector<6x32xf32>
    %269 = arith.addf %267, %268 : vector<6x32xf32>
    %270 = vector.broadcast %215 : vector<1x32xf32> to vector<6x32xf32>
    %271 = arith.addf %269, %270 : vector<6x32xf32>
    %272 = math.tanh %271 : vector<6x32xf32>
    %cst_91 = arith.constant dense<0.000000e+00> : vector<6x128xf32>
    %273 = tpu.matmul %272, %216, %cst_91 {dimension_numbers = #tpu.dot_dimension_numbers<[1], [0], [0], [1], [0, 0, 1, 1], [], []>} : vector<6x32xf32>, vector<32x128xf32>, vector<6x128xf32> -> vector<6x128xf32>
    %274 = vector.broadcast %217 : vector<1x128xf32> to vector<6x128xf32>
    %275 = arith.addf %273, %274 : vector<6x128xf32>
    %276 = tpu.concatenate %246, %275 in 0 : vector<6x128xf32>, vector<6x128xf32> -> vector<12x128xf32>
    %c0_92 = arith.constant 0 : index
    %c0_93 = arith.constant 0 : index
    %277 = vector.load %arg18[%c0_92, %c0_93] : memref<12x128xf32, #tpu.memory_space<vmem>>, vector<12x128xf32>
    tpu.vector_store %arg18[%c0_92, %c0_93], %276 {strides = array<i32>} : memref<12x128xf32, #tpu.memory_space<vmem>>, vector<12x128xf32>,
    return
  }
  func.func @transform_0(%arg0: i32) -> (i32, i32) {
    %c0_i32 = arith.constant 0 : i32
    %c0_i32_0 = arith.constant 0 : i32
    %c0_i32_1 = arith.constant 0 : i32
    return %c0_i32, %c0_i32_0 : i32, i32
  }
  func.func @transform_1(%arg0: i32) -> (i32, i32) {
    %c0_i32 = arith.constant 0 : i32
    %c0_i32_0 = arith.constant 0 : i32
    %c0_i32_1 = arith.constant 0 : i32
    return %c0_i32, %c0_i32_0 : i32, i32
  }
  func.func @transform_2(%arg0: i32) -> (i32, i32) {
    %c0_i32 = arith.constant 0 : i32
    %c0_i32_0 = arith.constant 0 : i32
    %c0_i32_1 = arith.constant 0 : i32
    return %c0_i32, %c0_i32_0 : i32, i32
  }
  func.func @transform_3(%arg0: i32) -> (i32, i32) {
    %c0_i32 = arith.constant 0 : i32
    %c0_i32_0 = arith.constant 0 : i32
    %c0_i32_1 = arith.constant 0 : i32
    return %c0_i32, %c0_i32_0 : i32, i32
  }
  func.func @transform_4(%arg0: i32) -> (i32, i32) {
    %c0_i32 = arith.constant 0 : i32
    %c0_i32_0 = arith.constant 0 : i32
    %c0_i32_1 = arith.constant 0 : i32
    return %c0_i32, %c0_i32_0 : i32, i32
  }
  func.func @transform_5(%arg0: i32) -> (i32, i32) {
    %c0_i32 = arith.constant 0 : i32
    %c0_i32_0 = arith.constant 0 : i32
    %c0_i32_1 = arith.constant 0 : i32
    return %c0_i32, %c0_i32_0 : i32, i32
  }
  func.func @transform_6(%arg0: i32) -> (i32, i32) {
    %c0_i32 = arith.constant 0 : i32
    %c0_i32_0 = arith.constant 0 : i32
    %c0_i32_1 = arith.constant 0 : i32
    return %c0_i32, %c0_i32_0 : i32, i32
  }
  func.func @transform_7(%arg0: i32) -> (i32, i32) {
    %c0_i32 = arith.constant 0 : i32
    %c0_i32_0 = arith.constant 0 : i32
    %c0_i32_1 = arith.constant 0 : i32
    return %c0_i32, %c0_i32_0 : i32, i32
  }
  func.func @transform_8(%arg0: i32) -> (i32, i32) {
    %c0_i32 = arith.constant 0 : i32
    %c0_i32_0 = arith.constant 0 : i32
    %c0_i32_1 = arith.constant 0 : i32
    return %c0_i32, %c0_i32_0 : i32, i32
  }
  func.func @transform_9(%arg0: i32) -> (i32, i32) {
    %c0_i32 = arith.constant 0 : i32
    %c0_i32_0 = arith.constant 0 : i32
    %c0_i32_1 = arith.constant 0 : i32
    return %c0_i32, %c0_i32_0 : i32, i32
  }
  func.func @transform_10(%arg0: i32) -> (i32, i32) {
    %c0_i32 = arith.constant 0 : i32
    %c0_i32_0 = arith.constant 0 : i32
    %c0_i32_1 = arith.constant 0 : i32
    return %c0_i32, %c0_i32_0 : i32, i32
  }
  func.func @transform_11(%arg0: i32) -> (i32, i32, i32) {
    %c0_i32 = arith.constant 0 : i32
    %c0_i32_0 = arith.constant 0 : i32
    %c0_i32_1 = arith.constant 0 : i32
    %c0_i32_2 = arith.constant 0 : i32
    return %c0_i32, %c0_i32_0, %c0_i32_1 : i32, i32, i32
  }
  func.func @transform_12(%arg0: i32) -> (i32, i32) {
    %c0_i32 = arith.constant 0 : i32
    %c0_i32_0 = arith.constant 0 : i32
    %c0_i32_1 = arith.constant 0 : i32
    return %c0_i32, %c0_i32_0 : i32, i32
  }
  func.func @transform_13(%arg0: i32) -> (i32, i32) {
    %c0_i32 = arith.constant 0 : i32
    %c0_i32_0 = arith.constant 0 : i32
    %c0_i32_1 = arith.constant 0 : i32
    return %c0_i32, %c0_i32_0 : i32, i32
  }
  func.func @transform_14(%arg0: i32) -> (i32, i32) {
    %c0_i32 = arith.constant 0 : i32
    %c0_i32_0 = arith.constant 0 : i32
    %c0_i32_1 = arith.constant 0 : i32
    return %c0_i32, %c0_i32_0 : i32, i32
  }
  func.func @transform_15(%arg0: i32) -> (i32, i32) {
    %c0_i32 = arith.constant 0 : i32
    %c0_i32_0 = arith.constant 0 : i32
    %c0_i32_1 = arith.constant 0 : i32
    return %c0_i32, %c0_i32_0 : i32, i32
  }
  func.func @transform_16(%arg0: i32) -> (i32, i32) {
    %c0_i32 = arith.constant 0 : i32
    %c0_i32_0 = arith.constant 0 : i32
    %c0_i32_1 = arith.constant 0 : i32
    return %c0_i32, %c0_i32_0 : i32, i32
  }
  func.func @transform_17(%arg0: i32) -> (i32, i32) {
    %c0_i32 = arith.constant 0 : i32
    %c0_i32_0 = arith.constant 0 : i32
    %c0_i32_1 = arith.constant 0 : i32
    return %c0_i32, %c0_i32_0 : i32, i32
  }
  func.func @transform_18(%arg0: i32) -> (i32, i32) {
    %c0_i32 = arith.constant 0 : i32
    %c0_i32_0 = arith.constant 0 : i32
    %c0_i32_1 = arith.constant 0 : i32
    return %c0_i32, %c0_i32_0 : i32, i32
  }
}

</mosaic_0001>

<bundles_post_ra>
// kernel: decoder_forward.1
= control target key start
LH: loop header
LB: loop body
LE: loop exit
PB: predicated region body
PF: predicated region fallthrough
CT: control target
= control target key end

     0   :  { %s4529_s0 = inlined_call_operand.vmem [shape: s32[12,1], index: 0, kind: input, shape index: {}]   ;;  %s4530_s1 = inlined_call_operand.vmem [shape: f32[2,32], index: 1, kind: input, shape index: {}]   ;;  %s4531_s2 = inlined_call_operand.hbm [shape: f32[16,32], index: 2, kind: input, shape index: {}]   ;;  %s4532_s3 = inlined_call_operand.hbm [shape: f32[16,32], index: 3, kind: input, shape index: {}]   ;;  %s4533_s4 = inlined_call_operand.hbm [shape: f32[16,32], index: 4, kind: input, shape index: {}]   ;;  %s4534_s5 = inlined_call_operand.vmem [shape: f32[32,32], index: 5, kind: input, shape index: {}]   ;;  %s4535_s6 = inlined_call_operand.vmem [shape: f32[32,32], index: 6, kind: input, shape index: {}]   ;;  %s4536_s7 = inlined_call_operand.vmem [shape: f32[32,32], index: 7, kind: input, shape index: {}]   ;;  %s4537_s8 = inlined_call_operand.hbm [shape: f32[1,32], index: 8, kind: input, shape index: {}]   ;;  %s4538_s9 = inlined_call_operand.hbm [shape: f32[1,32], index: 9, kind: input, shape index: {}]   ;;  %s4539_s10 = inlined_call_operand.hbm [shape: f32[1,32], index: 10, kind: input, shape index: {}]   ;;  %s4540_s11 = inlined_call_operand.vmem [shape: f32[2,10,32], index: 11, kind: input, shape index: {}]   ;;  %s4541_s12 = inlined_call_operand.hbm [shape: f32[32,32], index: 12, kind: input, shape index: {}]   ;;  %s4542_s13 = inlined_call_operand.hbm [shape: f32[32,32], index: 13, kind: input, shape index: {}]   ;;  %s4543_s14 = inlined_call_operand.hbm [shape: f32[1,32], index: 14, kind: input, shape index: {}]   ;;  %s4544_s15 = inlined_call_operand.hbm [shape: f32[32,128], index: 15, kind: input, shape index: {}]   ;;  %s4545_s16 = inlined_call_operand.hbm [shape: f32[1,128], index: 16, kind: input, shape index: {}]   ;;  %s4546_s17 = inlined_call_operand.vmem [shape: f32[12,128], index: 17, kind: output, shape index: {0}]   ;;  %s4547_s18 = inlined_call_operand.hbm [shape: f32[2,32], index: 18, kind: output, shape index: {1}]  }
   0x1   :  { %4550 = sst [smem:[#allocation28_spill]] %s4529_s0 }
   0x2   :  { %4551 = sst [smem:[#allocation29_spill]] %s4530_s1 }
   0x3   :  { %4552 = sst [smem:[#allocation30_spill]] %s4531_s2 }
   0x4   :  { %24 = vsyncpa [#allocation3], 0 }
   0x5   :  { %25 = vsyncpa [#allocation6], 0 }
   0x6   :  { %26 = vsyncpa [#allocation9], 0 }
   0x7   :  { %27 = vsyncpa [#allocation12], 0 }
   0x8   :  { %28 = vsyncpa [#allocation15], 0 }
   0x9   :  { %29 = vsyncpa [#allocation18], 0 }
   0xa   :  { %30 = vsyncpa [#allocation4], 0  ;;  %s3864_s27 = smov [#allocation5]   ;;  %s3865_s29 = smov [#allocation8]  }
   0xb   :  { %s52_s28 = sshll.u32 %s3864_s27, 4  ;;  %s83_s30 = sshll.u32 %s3865_s29, 4  ;;  %s53_s28 = int_to_ptr.vmem [resolvable:$true] %s52_s28  ;;  %s3978_s30 = int_to_ptr.vmem [resolvable:$true] %s83_s30 }
   0xc   :  { %s3586_s1 = scalar_lea.hbm %s4532_s3, 256 }
   0xd   :  { %p3587_p0 = scmp.ne.s32.totalorder %s4532_s3, %s3586_s1  ;;  %p3590_p1 = scmp.lt.u32.totalorder %s3586_s1, %s4532_s3 }
   0xf   :  { %p3592_p2 = pnand %p3590_p1, %p3587_p0 }
  0x11   :  { %3595 = shalt.err (!%p3592_p2)
}
  0x12   :  { %s3596_s23 = scalar_lea.vmem %s53_s28, 256  ;;  %p3601_p4 = scmp.lt.s32.totalorder %s53_s28, %s53_s28 }
  0x13   :  { %p3597_p3 = scmp.ne.s32.totalorder %s53_s28, %s3596_s23  ;;  %p3602_p5 = scmp.lt.s32.totalorder %s3596_s23, %s3596_s23 }
  0x15   :  { %p3603_p6 = por %p3602_p5, %p3601_p4 }
  0x17   :  { %p3604_p7 = pnand %p3603_p6, %p3597_p3 }
  0x19   :  { %3607 = shalt.err (!%p3604_p7)
}
  0x1a   :  { %s3866_s24 = smov 128   ;;  %s3867_s25 = smov 8  }
  0x1b   :  { %58 = dma.hbm_to_vmem [thread:$0]  %s4532_s3, 256, %s53_s28, [#allocation6], %s3866_s24, %s3866_s24, %s3867_s25  }
  0x1c   :  { %s3608_s19 = scalar_lea.hbm %s4537_s8, 16 }
  0x1d   :  { %p3609_p8 = scmp.ne.s32.totalorder %s4537_s8, %s3608_s19  ;;  %p3612_p9 = scmp.lt.u32.totalorder %s3608_s19, %s4537_s8 }
  0x1f   :  { %p3614_p10 = pnand %p3612_p9, %p3609_p8 }
  0x21   :  { %3617 = shalt.err (!%p3614_p10)
}
  0x22   :  { %s3618_s2 = scalar_lea.vmem %s3978_s30, 16  ;;  %s3622_s3 = scalar_lea.vmem %s3978_s30, 32 }
  0x23   :  { %p3619_p11 = scmp.ne.s32.totalorder %s3978_s30, %s3618_s2  ;;  %p3623_p12 = scmp.lt.s32.totalorder %s3978_s30, %s3978_s30 }
  0x24   :  { %p3624_p13 = scmp.lt.s32.totalorder %s3622_s3, %s3618_s2 }
  0x26   :  { %p3625_p0 = por %p3624_p13, %p3623_p12 }
  0x28   :  { %p3626_p1 = pnand %p3625_p0, %p3619_p11 }
  0x2a   :  { %3629 = shalt.err (!%p3626_p1)
}
  0x2b   :  { %86 = dma.hbm_to_vmem [thread:$0]  %s4537_s8, 16, %s3978_s30, [#allocation9]  }
  0x2c   :  { %s3868_s26 = smov [#allocation11]   ;;  %s3869_s29 = smov [#allocation14]  }
  0x2d   :  { %s103_s27 = sshll.u32 %s3868_s26, 4  ;;  %s126_s0 = sshll.u32 %s3869_s29, 4  ;;  %s104_s27 = int_to_ptr.vmem [resolvable:$true] %s103_s27  ;;  %s4013_s0 = int_to_ptr.vmem [resolvable:$true] %s126_s0 }
  0x2e   :  { %s3630_s20 = scalar_lea.hbm %s4539_s10, 16 }
  0x2f   :  { %p3631_p2 = scmp.ne.s32.totalorder %s4539_s10, %s3630_s20  ;;  %p3634_p3 = scmp.lt.u32.totalorder %s3630_s20, %s4539_s10 }
  0x31   :  { %p3636_p4 = pnand %p3634_p3, %p3631_p2 }
  0x33   :  { %3639 = shalt.err (!%p3636_p4)
}
  0x34   :  { %s3640_s8 = scalar_lea.vmem %s104_s27, 16  ;;  %s3644_s30 = scalar_lea.vmem %s104_s27, 32 }
  0x35   :  { %p3641_p5 = scmp.ne.s32.totalorder %s104_s27, %s3640_s8  ;;  %p3645_p6 = scmp.lt.s32.totalorder %s104_s27, %s104_s27 }
  0x36   :  { %p3646_p7 = scmp.lt.s32.totalorder %s3644_s30, %s3640_s8 }
  0x38   :  { %p3647_p8 = por %p3646_p7, %p3645_p6 }
  0x3a   :  { %p3648_p9 = pnand %p3647_p8, %p3641_p5 }
  0x3c   :  { %3651 = shalt.err (!%p3648_p9)
}
  0x3d   :  { %106 = dma.hbm_to_vmem [thread:$0]  %s4539_s10, 16, %s104_s27, [#allocation12]  }
  0x3e   :  { %s3652_s19 = scalar_lea.hbm %s4542_s13, 512 }
  0x3f   :  { %p3653_p10 = scmp.ne.s32.totalorder %s4542_s13, %s3652_s19  ;;  %p3656_p11 = scmp.lt.u32.totalorder %s3652_s19, %s4542_s13 }
  0x41   :  { %p3658_p12 = pnand %p3656_p11, %p3653_p10 }
  0x43   :  { %3661 = shalt.err (!%p3658_p12)
}
  0x44   :  { %s3662_s2 = scalar_lea.vmem %s4013_s0, 512  ;;  %p3667_p0 = scmp.lt.s32.totalorder %s4013_s0, %s4013_s0 }
  0x45   :  { %p3663_p13 = scmp.ne.s32.totalorder %s4013_s0, %s3662_s2  ;;  %p3668_p1 = scmp.lt.s32.totalorder %s3662_s2, %s3662_s2 }
  0x47   :  { %p3669_p2 = por %p3668_p1, %p3667_p0 }
  0x49   :  { %p3670_p3 = pnand %p3669_p2, %p3663_p13 }
  0x4b   :  { %3673 = shalt.err (!%p3670_p3)
}
  0x4c   :  { %132 = dma.hbm_to_vmem [thread:$0]  %s4542_s13, 512, %s4013_s0, [#allocation15], %s3866_s24, %s3866_s24, %s3867_s25  }
  0x4d   :  { %s3870_s3 = smov [#allocation17]   ;;  %s3871_s30 = smov [#allocation2]  }
  0x4e   :  { %s148_s8 = sshll.u32 %s3870_s3, 4  ;;  %s40_s28 = sshll.u32 %s3871_s30, 4  ;;  %s149_s8 = int_to_ptr.vmem [resolvable:$true] %s148_s8  ;;  %s4047_s28 = int_to_ptr.vmem [resolvable:$true] %s40_s28 }
  0x4f   :  { %s3674_s29 = scalar_lea.hbm %s4544_s15, 512 }
  0x50   :  { %p3675_p4 = scmp.ne.s32.totalorder %s4544_s15, %s3674_s29  ;;  %p3678_p5 = scmp.lt.u32.totalorder %s3674_s29, %s4544_s15 }
  0x52   :  { %p3680_p6 = pnand %p3678_p5, %p3675_p4 }
  0x54   :  { %3683 = shalt.err (!%p3680_p6)
}
  0x55   :  { %s3684_s13 = scalar_lea.vmem %s149_s8, 512  ;;  %p3689_p8 = scmp.lt.s32.totalorder %s149_s8, %s149_s8 }
  0x56   :  { %p3685_p7 = scmp.ne.s32.totalorder %s149_s8, %s3684_s13  ;;  %p3690_p9 = scmp.lt.s32.totalorder %s3684_s13, %s3684_s13 }
  0x58   :  { %p3691_p10 = por %p3690_p9, %p3689_p8 }
  0x5a   :  { %p3692_p11 = pnand %p3691_p10, %p3685_p7 }
  0x5c   :  { %3695 = shalt.err (!%p3692_p11)
}
  0x5d   :  { %154 = dma.hbm_to_vmem [thread:$0]  %s4544_s15, 512, %s149_s8, [#allocation18], %s3866_s24, %s3866_s24, %s3867_s25  }
  0x5e   :  { %s4553_s27 = sld [smem:[#allocation30_spill]] }
  0x64   :  { %s3696_s3 = scalar_lea.hbm %s4553_s27, 256 }
  0x65   :  { %p3697_p12 = scmp.ne.s32.totalorder %s4553_s27, %s3696_s3  ;;  %p3700_p13 = scmp.lt.u32.totalorder %s3696_s3, %s4553_s27 }
  0x67   :  { %p3702_p0 = pnand %p3700_p13, %p3697_p12 }
  0x69   :  { %3705 = shalt.err (!%p3702_p0)
}
  0x6a   :  { %s3706_s19 = scalar_lea.vmem %s4047_s28, 256  ;;  %p3711_p2 = scmp.lt.s32.totalorder %s4047_s28, %s4047_s28 }
  0x6b   :  { %p3707_p1 = scmp.ne.s32.totalorder %s4047_s28, %s3706_s19  ;;  %p3712_p3 = scmp.lt.s32.totalorder %s3706_s19, %s3706_s19 }
  0x6d   :  { %p3713_p4 = por %p3712_p3, %p3711_p2 }
  0x6f   :  { %p3714_p5 = pnand %p3713_p4, %p3707_p1 }
  0x71   :  { %3717 = shalt.err (!%p3714_p5)
}
  0x72   :  { %46 = dma.hbm_to_vmem [thread:$0]  %s4553_s27, 256, %s4047_s28, [#allocation3], %s3866_s24, %s3866_s24, %s3867_s25  }
  0x73   :  { %s3872_s1 = smov [#allocation7]   ;;  %s3873_s21 = smov [#allocation10]  }
  0x74   :  { %s64_s20 = sshll.u32 %s3872_s1, 4  ;;  %s93_s13 = sshll.u32 %s3873_s21, 4  ;;  %s65_s20 = int_to_ptr.vmem [resolvable:$true] %s64_s20  ;;  %s94_s13 = int_to_ptr.vmem [resolvable:$true] %s93_s13 }
  0x75   :  { %s3718_s2 = scalar_lea.hbm %s4533_s4, 256 }
  0x76   :  { %p3719_p6 = scmp.ne.s32.totalorder %s4533_s4, %s3718_s2  ;;  %p3722_p7 = scmp.lt.u32.totalorder %s3718_s2, %s4533_s4 }
  0x78   :  { %p3724_p8 = pnand %p3722_p7, %p3719_p6 }
  0x7a   :  { %3727 = shalt.err (!%p3724_p8)
}
  0x7b   :  { %s3728_s28 = scalar_lea.vmem %s65_s20, 256  ;;  %p3733_p10 = scmp.lt.s32.totalorder %s65_s20, %s65_s20 }
  0x7c   :  { %p3729_p9 = scmp.ne.s32.totalorder %s65_s20, %s3728_s28  ;;  %p3734_p11 = scmp.lt.s32.totalorder %s3728_s28, %s3728_s28 }
  0x7e   :  { %p3735_p12 = por %p3734_p11, %p3733_p10 }
  0x80   :  { %p3736_p13 = pnand %p3735_p12, %p3729_p9 }
  0x82   :  { %3739 = shalt.err (!%p3736_p13)
}
  0x83   :  { %70 = dma.hbm_to_vmem [thread:$0]  %s4533_s4, 256, %s65_s20, [#allocation6], %s3866_s24, %s3866_s24, %s3867_s25  }
  0x84   :  { %s3740_s15 = scalar_lea.hbm %s4538_s9, 16 }
  0x85   :  { %p3741_p0 = scmp.ne.s32.totalorder %s4538_s9, %s3740_s15  ;;  %p3744_p1 = scmp.lt.u32.totalorder %s3740_s15, %s4538_s9 }
  0x87   :  { %p3746_p2 = pnand %p3744_p1, %p3741_p0 }
  0x89   :  { %3749 = shalt.err (!%p3746_p2)
}
  0x8a   :  { %s3750_s22 = scalar_lea.vmem %s94_s13, 16  ;;  %s3754_s2 = scalar_lea.vmem %s94_s13, 32 }
  0x8b   :  { %p3751_p3 = scmp.ne.s32.totalorder %s94_s13, %s3750_s22  ;;  %p3755_p4 = scmp.lt.s32.totalorder %s94_s13, %s94_s13 }
  0x8c   :  { %p3756_p5 = scmp.lt.s32.totalorder %s3754_s2, %s3750_s22 }
  0x8e   :  { %p3757_p6 = por %p3756_p5, %p3755_p4 }
  0x90   :  { %p3758_p7 = pnand %p3757_p6, %p3751_p3 }
  0x92   :  { %3761 = shalt.err (!%p3758_p7)
}
  0x93   :  { %96 = dma.hbm_to_vmem [thread:$0]  %s4538_s9, 16, %s94_s13, [#allocation9]  }
  0x94   :  { %s3874_s10 = smov [#allocation13]   ;;  %s3875_s30 = smov [#allocation16]  }
  0x95   :  { %s114_s3 = sshll.u32 %s3874_s10, 4  ;;  %s139_s23 = sshll.u32 %s3875_s30, 4  ;;  %s115_s3 = int_to_ptr.vmem [resolvable:$true] %s114_s3  ;;  %s140_s23 = int_to_ptr.vmem [resolvable:$true] %s139_s23 }
  0x96   :  { %s3762_s26 = scalar_lea.hbm %s4541_s12, 512 }
  0x97   :  { %p3763_p8 = scmp.ne.s32.totalorder %s4541_s12, %s3762_s26  ;;  %p3766_p9 = scmp.lt.u32.totalorder %s3762_s26, %s4541_s12 }
  0x99   :  { %p3768_p10 = pnand %p3766_p9, %p3763_p8 }
  0x9b   :  { %3771 = shalt.err (!%p3768_p10)
}
  0x9c   :  { %s3772_s9 = scalar_lea.vmem %s115_s3, 512  ;;  %p3777_p12 = scmp.lt.s32.totalorder %s115_s3, %s115_s3 }
  0x9d   :  { %p3773_p11 = scmp.ne.s32.totalorder %s115_s3, %s3772_s9  ;;  %p3778_p13 = scmp.lt.s32.totalorder %s3772_s9, %s3772_s9 }
  0x9f   :  { %p3779_p0 = por %p3778_p13, %p3777_p12 }
  0xa1   :  { %p3780_p1 = pnand %p3779_p0, %p3773_p11 }
  0xa3   :  { %3783 = shalt.err (!%p3780_p1)
}
  0xa4   :  { %120 = dma.hbm_to_vmem [thread:$0]  %s4541_s12, 512, %s115_s3, [#allocation12], %s3866_s24, %s3866_s24, %s3867_s25  }
  0xa5   :  { %s3784_s22 = scalar_lea.hbm %s4543_s14, 16 }
  0xa6   :  { %p3785_p2 = scmp.ne.s32.totalorder %s4543_s14, %s3784_s22  ;;  %p3788_p3 = scmp.lt.u32.totalorder %s3784_s22, %s4543_s14 }
  0xa8   :  { %p3790_p4 = pnand %p3788_p3, %p3785_p2 }
  0xaa   :  { %3793 = shalt.err (!%p3790_p4)
}
  0xab   :  { %s3794_s30 = scalar_lea.vmem %s140_s23, 16  ;;  %s3798_s28 = scalar_lea.vmem %s140_s23, 32 }
  0xac   :  { %p3795_p5 = scmp.ne.s32.totalorder %s140_s23, %s3794_s30  ;;  %p3799_p6 = scmp.lt.s32.totalorder %s140_s23, %s140_s23 }
  0xad   :  { %p3800_p7 = scmp.lt.s32.totalorder %s3798_s28, %s3794_s30 }
  0xaf   :  { %p3801_p8 = por %p3800_p7, %p3799_p6 }
  0xb1   :  { %p3802_p9 = pnand %p3801_p8, %p3795_p5 }
  0xb3   :  { %3805 = shalt.err (!%p3802_p9)
}
  0xb4   :  { %142 = dma.hbm_to_vmem [thread:$0]  %s4543_s14, 16, %s140_s23, [#allocation15]  }
  0xb5   :  { %s3876_s25 = smov [#allocation19]   ;;  %s3806_s29 = scalar_lea.hbm %s4545_s16, 16 }
  0xb6   :  { %s161_s3 = sshll.u32 %s3876_s25, 4  ;;  %p3807_p10 = scmp.ne.s32.totalorder %s4545_s16, %s3806_s29  ;;  %s162_s3 = int_to_ptr.vmem [resolvable:$true] %s161_s3 }
  0xb7   :  { %p3810_p11 = scmp.lt.u32.totalorder %s3806_s29, %s4545_s16 }
  0xb9   :  { %p3812_p12 = pnand %p3810_p11, %p3807_p10 }
  0xbb   :  { %3815 = shalt.err (!%p3812_p12)
}
  0xbc   :  { %s3816_s13 = scalar_lea.vmem %s162_s3, 16  ;;  %s3820_s14 = scalar_lea.vmem %s162_s3, 32 }
  0xbd   :  { %p3817_p13 = scmp.ne.s32.totalorder %s162_s3, %s3816_s13  ;;  %p3821_p0 = scmp.lt.s32.totalorder %s162_s3, %s162_s3 }
  0xbe   :  { %p3822_p1 = scmp.lt.s32.totalorder %s3820_s14, %s3816_s13 }
  0xc0   :  { %p3823_p2 = por %p3822_p1, %p3821_p0 }
  0xc2   :  { %p3824_p3 = pnand %p3823_p2, %p3817_p13 }
  0xc4   :  { %3827 = shalt.err (!%p3824_p3)
}
  0xc5   :  { %164 = dma.hbm_to_vmem [thread:$0]  %s4545_s16, 16, %s162_s3, [#allocation18]  }
  0xc6   :  { %3850 = dma.done.wait [#allocation3], 256  }
  0xc7   :  { %3851 = vsyncadd [#allocation3], 4294967040 }
  0xc8   :  { %3852 = dma.done.wait [#allocation6], 512  }
  0xc9   :  { %3853 = vsyncadd [#allocation6], 4294966784 }
  0xca   :  { %3854 = dma.done.wait [#allocation9], 32  }
  0xcb   :  { %3855 = vsyncadd [#allocation9], 4294967264 }
  0xcc   :  { %3856 = dma.done.wait [#allocation12], 528  }
  0xcd   :  { %3857 = vsyncadd [#allocation12], 4294966768 }
  0xce   :  { %3858 = dma.done.wait [#allocation15], 528  }
  0xcf   :  { %3859 = vsyncadd [#allocation15], 4294966768 }
  0xd0   :  { %3860 = dma.done.wait [#allocation18], 528  }
  0xd1   :  { %3861 = vsyncadd [#allocation18], 4294966768  ;;  %v3877_v0 = vmov 0   ;;  %s4554_s22 = sld [smem:[#allocation28_spill]]  ;;  %v212_v2 = vld [vmem:[#allocation2] sm:$0xff]  ;;  %v213_v3 = vld [vmem:[#allocation2 + $0x8] sm:$0xff]  ;;  %v200_v13 = vlaneseq }
  0xd2   :  { %3513 = vset.pattern.permute.xlu0 %v3877_v0  ;;  %v296_v4 = vld [vmem:[#allocation5] sm:$0xff]  ;;  %v297_v5 = vld [vmem:[#allocation5 + $0x8] sm:$0xff]  ;;  %v3322_v7 = vpack.c.bf16 %v213_v3, %v212_v2  ;;  %v373_v9 = vld [vmem:[#allocation7] sm:$0xff]  ;;  %v3878_v12 = vmov 0.0|0.0   ;;  %vm214_vm0 = vcmask 130048   ;;  %v3879_v18 = vmov 0.0  }
  0xd3   :  { %v3326_v8 = vpack.c.bf16 %v297_v5, %v296_v4  ;;  %v374_v10 = vld [vmem:[#allocation7 + $0x8] sm:$0xff]  ;;  %v201_v14 = vand.u32 127, %v200_v13  ;;  %v450_v16 = vld [vmem:[%s4534_s5] sm:$0xff]  ;;  %v452_v22 = vld [vmem:[%s4534_s5 + $0x10] sm:$0xff]  ;;  %vm3880_vm3 = vmmov 0   ;;  %s4555_s21 = sld [smem:[#allocation29_spill]] }
  0xd4   :  { %3323 = vmatprep.subr.bf16.mxu0 %v3322_v7  ;;  %v3330_v11 = vpack.c.bf16 %v374_v10, %v373_v9  ;;  %v451_v17 = vld [vmem:[%s4534_s5 + $0x8] sm:$0xff]  ;;  %v453_v23 = vld [vmem:[%s4534_s5 + $0x18] sm:$0xff]  ;;  %v454_v24 = vld [vmem:[%s4535_s6] sm:$0xff]  ;;  %vm472_vm4 = vcmask 261120   ;;  %vm1964_vm5 = vcmask 1040384   ;;  %vm1966_vm6 = vcmask 1041408  }
  0xd5   :  { %3327 = vmatprep.subr.bf16.mxu1 %v3326_v8  ;;  %3325 = vmatpush3.bf16.msra.mxu0 %v3322_v7  ;;  %v4166_v21 = vpack.c.bf16 %v451_v17, %v450_v16  ;;  %v455_v25 = vld [vmem:[%s4535_s6 + $0x8] sm:$0xff]  ;;  %v4184_v27 = vpack.c.bf16 %v453_v23, %v452_v22  ;;  %v456_v29 = vld [vmem:[%s4535_s6 + $0x10] sm:$0xff]  ;;  %v457_v30 = vld [vmem:[%s4535_s6 + $0x18] sm:$0xff]  ;;  %vm1968_vm7 = vcmask 1042432   ;;  %vm1970_vm8 = vcmask 1043456  }
  0xd6   :  { %3329 = vmatpush3.bf16.msra.mxu1 %v3326_v8  ;;  %3331 = vmatprep.subr.bf16.mxu0 %v3330_v11  ;;  %v4186_v28 = vpack.c.bf16 %v455_v25, %v454_v24  ;;  %v458_v31 = vld [vmem:[%s4536_s7] sm:$0xff]  ;;  %v459_v32 = vld [vmem:[%s4536_s7 + $0x8] sm:$0xff]  ;;  %v4213_v34 = vpack.c.bf16 %v457_v30, %v456_v29  ;;  %v460_v36 = vld [vmem:[%s4536_s7 + $0x10] sm:$0xff]  ;;  %vm1937_vm10 = vcmask 257026   ;;  %vm1972_vm11 = vcmask 1044480  }
  0xd7   :  { %v198_v1 = vld [vmem:[%s4554_s22] sm:$0xff]  ;;  %v199_v6 = vld [vmem:[%s4554_s22 + $0x8] sm:$0xf]  ;;  %3334 = vmatprep.subr.bf16.mxu1 %v3878_v12  ;;  %v4215_v35 = vpack.c.bf16 %v459_v32, %v458_v31  ;;  %v461_v37 = vld [vmem:[%s4536_s7 + $0x18] sm:$0xff]  ;;  %vm2055_vm12 = vcmask 78848   ;;  %vm3881_vm13 = vmmov 1  }
  0xd8   :  { %203 = vperm.xlu0 %3513, %v198_v1   ;;  %v4231_v38 = vpack.c.bf16 %v461_v37, %v460_v36  ;;  %v4267_v45 = vld [vmem:[#allocation8] ss:$0 sm:$0xff]  ;;  %v4270_v49 = vld [vmem:[#allocation10] ss:$0 sm:$0xff]  ;;  %v4275_v62 = vld [vmem:[#allocation11] ss:$0 sm:$0xff] }
  0xd9   :  { %v4211_v33 = vld [vmem:[%s4555_s21] sm:$0x3]  ;;  %vm4426_vm9 = vmpackc.low %vm472_vm4, %vm472_vm4  ;;  %vm2067_vm15 = vcmask 80896  }
  0xda   :  { %vm4447_vm14 = vmpackc.low %vm1966_vm6, %vm3881_vm13 }
  0xdc   :  { %206 = vperm.xlu0 %3513, %v199_v6  }
 0x157   :  { %v204_v15 = vpop.permute.xlu0 %203 }
 0x158   :  { %vm208_vm1 = vcmp.eq.s32.totalorder %v204_v15, %v201_v14 }
 0x159   :  { %v210_v19 = vsel %vm208_vm1, 1.0, %v3879_v18 }
 0x15a   :  { %3013 = vmatprep.mubr.msk.f32.mxu0 %vm214_vm0, %v210_v19  ;;  %3020 = vmatprep.mubr.msk.f32.mxu1 %vm214_vm0, %v210_v19 }
 0x15b   :  { %v207_v20 = vpop.permute.xlu0 %206 }
 0x15c   :  { %vm209_vm2 = vcmp.eq.s32.totalorder %v207_v20, %v201_v14 }
 0x15d   :  { %v211_v26 = vsel %vm209_vm2, 1.0, %v3879_v18 }
 0x15e   :  { %3014 = vmatmul.mubr.msk.f32.vlgmr.msra.gmra.mrb[0].mxu0 %vm214_vm0, %v211_v26  ;;  %3021 = vmatmul.mubr.msk.f32.vlgmr.msra.gmra.mrb[0].mxu1 %vm214_vm0, %v211_v26 }
 0x15f   :  { %3333 = vmatpush3.bf16.msra.mxu0 %v3330_v11  ;;  %3336 = vmatpush3.bf16.msra.mxu1 %v4166_v21 }
 0x160   :  { %3027 = vmatprep.mubr.msk.f32.mxu0 %vm214_vm0, %v210_v19  ;;  %3337 = vmatprep.subr.bf16.mxu1 %v3878_v12 }
 0x161   :  { %3340 = vmatprep.subr.bf16.mxu0 %v3878_v12  ;;  %3038 = vmatprep.mubr.msk.f32.mxu1 %vm3880_vm3, %v3879_v18 }
 0x162   :  { %3028 = vmatmul.mubr.msk.f32.vlgmr.msra.gmra.mrb[2].mxu0 %vm214_vm0, %v211_v26 }
 0x163   :  { %3339 = vmatpush3.bf16.msra.mxu1 %v4184_v27  ;;  %3342 = vmatpush3.bf16.msra.mxu0 %v4186_v28 }
 0x164   :  { %3343 = vmatprep.subr.bf16.mxu0 %v3878_v12  ;;  %3049 = vmatprep.mubr.msk.f32.mxu0 %vm3880_vm3, %v3879_v18 }
 0x165   :  { %3346 = vmatprep.subr.bf16.mxu1 %v3878_v12 }
 0x166   :  { %3039 = vmatmul.mubr.msk.f32.vlgmr.msra.gmra.mrb[2].mxu1 %vm472_vm4, %v4211_v33 }
 0x167   :  { %3345 = vmatpush3.bf16.msra.mxu0 %v4213_v34  ;;  %3348 = vmatpush3.bf16.msra.mxu1 %v4215_v35 }
 0x168   :  { %3349 = vmatprep.subr.bf16.mxu1 %v3878_v12  ;;  %3060 = vmatprep.mubr.msk.f32.mxu1 %vm3880_vm3, %v3879_v18 }
 0x169   :  { %3352 = vmatprep.subr.bf16.mxu0 %v3878_v12 }
 0x16a   :  { %3050 = vmatmul.mubr.msk.f32.vlgmr.msra.gmra.mrb[4].mxu0 %vm472_vm4, %v4211_v33 }
 0x16b   :  { %3351 = vmatpush3.bf16.msra.mxu1 %v4231_v38  ;;  %3354 = vmatpush3.bf16.msra.mxu0 %v4166_v21 }
 0x16c   :  { %3358 = vmatprep.subr.bf16.mxu1 %v3878_v12  ;;  %3355 = vmatprep.subr.bf16.mxu0 %v3878_v12 }
 0x16d   :  { %3071 = vmatprep.mubr.msk.f32.mxu0 %vm3880_vm3, %v3879_v18 }
 0x16e   :  { %3061 = vmatmul.mubr.msk.f32.vlgmr.msra.gmra.mrb[4].mxu1 %vm472_vm4, %v4211_v33 }
 0x16f   :  { %3360 = vmatpush3.bf16.msra.mxu1 %v4186_v28  ;;  %3357 = vmatpush3.bf16.msra.mxu0 %v4184_v27 }
 0x170   :  { %3361 = vmatprep.subr.bf16.mxu1 %v3878_v12  ;;  %3082 = vmatprep.mubr.msk.f32.mxu1 %vm3880_vm3, %v3879_v18 }
 0x171   :  { %3364 = vmatprep.subr.bf16.mxu0 %v3878_v12 }
 0x173   :  { %3363 = vmatpush3.bf16.msra.mxu1 %v4213_v34 }
 0x174   :  { %3370 = vmatprep.subr.bf16.mxu1 %v3878_v12 }
 0x231   :  { %v4255_v39 = vpop.f32.mrb[0].mxu0  ;;  %v4257_v40 = vpop.f32.mrb[0].mxu1 }
 0x232   :  { %v4259_v41 = vpop.f32.mrb[1].mxu0  ;;  %v4261_v42 = vpop.f32.mrb[1].mxu1 }
 0x235   :  { %v4263_v43 = vpop.f32.mrb[2].mxu0 }
 0x236   :  { %v4265_v44 = vpop.f32.mrb[3].mxu0 }
 0x239   :  { %v542_v46 = vpop.f32.mrb[2].mxu1 }
 0x23a   :  { %v543_v47 = vadd.f32 %v4267_v45, %v542_v46  ;;  %v3040_v48 = vpop.f32.mrb[3].mxu1 }
 0x23c   :  { %v698_v50 = vadd.f32 %v543_v47, %v4259_v41 }
 0x23d   :  { %v618_v51 = vpop.f32.mrb[4].mxu0 }
 0x23e   :  { %v2818_v52 = vmul.f32 -1.442695, %v698_v50  ;;  %v619_v53 = vadd.f32 %v4270_v49, %v618_v51  ;;  %v3051_v54 = vpop.f32.mrb[5].mxu0 }
 0x240   :  { %3514 = vpow2.f32 %v2818_v52  ;;  %v705_v55 = vadd.f32 %v619_v53, %v4261_v42 }
 0x241   :  { %v694_v56 = vpop.f32.mrb[4].mxu1 }
 0x242   :  { %v3062_v57 = vpop.f32.mrb[5].mxu1  ;;  %v2819_v58 = vmul.f32 -1.442695, %v705_v55  ;;  %v695_v0 = vadd.f32 %v4275_v62, %v694_v56 }
 0x244   :  { %3516 = vpow2.f32 %v2819_v58 }
 0x24a   :  { %v3515_v59 = vpop.eup %3514 }
 0x24b   :  { %v702_v60 = vadd.f32 1.0, %v3515_v59 }
 0x24d   :  { %3518 = vrcp.f32 %v702_v60 }
 0x24e   :  { %v3517_v61 = vpop.eup %3516 }
 0x24f   :  { %v709_v63 = vadd.f32 1.0, %v3517_v61 }
 0x251   :  { %3520 = vrcp.f32 %v709_v63 }
 0x257   :  { %v3519_v1 = vpop.eup %3518 }
 0x258   :  { %v712_v2 = vmul.f32 %v3519_v1, %v695_v0 }
 0x25a   :  { %v713_v3 = vadd.f32 %v712_v2, %v4265_v44 }
 0x25b   :  { %v3521_v4 = vpop.eup %3520 }
 0x25c   :  { %3522 = vtanh.f32 %v713_v3  ;;  %v715_v5 = vsub.f32 1.0, %v3521_v4  ;;  %v717_v7 = vmul.f32 %v3521_v4, %v4211_v33 }
 0x266   :  { %v3523_v6 = vpop.eup %3522 }
 0x267   :  { %v716_v8 = vmul.f32 %v3523_v6, %v715_v5 }
 0x269   :  { %v4280_v9 = vadd.f32 %v717_v7, %v716_v8 }
 0x26b   :  { %3072 = vmatmul.mubr.msk.f32.vlgmr.msra.gmra.mrb[6].mxu0 %vm472_vm4, %v4280_v9  ;;  %3083 = vmatmul.mubr.msk.f32.vlgmr.msra.gmra.mrb[6].mxu1 %vm472_vm4, %v4280_v9  ;;  %v960_v51 = vrot.slane %v4280_v9, 6  ;;  %v2373_v57 = vrot.slane %v4280_v9, 1 }
 0x26c   :  { %3366 = vmatpush3.bf16.msra.mxu0 %v4215_v35  ;;  %3093 = vmatprep.mubr.msk.f32.mxu0 %vm3880_vm3, %v3879_v18 }
 0x26d   :  { %3367 = vmatprep.subr.bf16.mxu0 %v3878_v12  ;;  %3372 = vmatpush3.bf16.msra.mxu1 %v4166_v21 }
 0x26e   :  { %3373 = vmatprep.subr.bf16.mxu1 %v3878_v12  ;;  %3104 = vmatprep.mubr.msk.f32.mxu1 %vm3880_vm3, %v3879_v18 }
 0x270   :  { %3369 = vmatpush3.bf16.msra.mxu0 %v4231_v38 }
 0x271   :  { %3376 = vmatprep.subr.bf16.mxu0 %v3878_v12  ;;  %3375 = vmatpush3.bf16.msra.mxu1 %v4184_v27 }
 0x272   :  { %3382 = vmatprep.subr.bf16.mxu1 %v3878_v12 }
 0x273   :  { %3094 = vmatmul.mubr.msk.f32.vlgmr.msra.gmra.mrb[8].mxu0 %vm472_vm4, %v4280_v9 }
 0x274   :  { %3378 = vmatpush3.bf16.msra.mxu0 %v4186_v28  ;;  %3115 = vmatprep.mubr.msk.f32.mxu0 %vm3880_vm3, %v3879_v18 }
 0x275   :  { %3379 = vmatprep.subr.bf16.mxu0 %v3878_v12 }
 0x278   :  { %3381 = vmatpush3.bf16.msra.mxu0 %v4213_v34 }
 0x279   :  { %3388 = vmatprep.subr.bf16.mxu0 %v3878_v12 }
 0x33e   :  { %v788_v10 = vpop.f32.mrb[6].mxu0  ;;  %v858_v11 = vpop.f32.mrb[6].mxu1 }
 0x33f   :  { %v789_v13 = vadd.f32 %v4267_v45, %v788_v10  ;;  %v859_v14 = vadd.f32 %v4270_v49, %v858_v11  ;;  %v3073_v15 = vpop.f32.mrb[7].mxu0  ;;  %v3084_v16 = vpop.f32.mrb[7].mxu1 }
 0x341   :  { %v933_v17 = vrot.slane %v789_v13, 6  ;;  %v943_v19 = vrot.slane %v859_v14, 6 }
 0x343   :  { %v935_v20 = vadd.f32 %v933_v17, %v4259_v41  ;;  %v945_v22 = vadd.f32 %v943_v19, %v4261_v42 }
 0x345   :  { %v2823_v23 = vmul.f32 -1.442695, %v935_v20  ;;  %v2824_v26 = vmul.f32 -1.442695, %v945_v22 }
 0x346   :  { %v928_v24 = vpop.f32.mrb[8].mxu0 }
 0x347   :  { %3524 = vpow2.f32 %v2823_v23  ;;  %v3095_v25 = vpop.f32.mrb[9].mxu0  ;;  %v929_v32 = vadd.f32 %v4275_v62, %v928_v24 }
 0x348   :  { %3526 = vpow2.f32 %v2824_v26 }
 0x349   :  { %v953_v36 = vrot.slane %v929_v32, 6 }
 0x351   :  { %v3525_v29 = vpop.eup %3524 }
 0x352   :  { %v939_v30 = vadd.f32 1.0, %v3525_v29  ;;  %v3527_v31 = vpop.eup %3526 }
 0x353   :  { %v949_v33 = vadd.f32 1.0, %v3527_v31 }
 0x354   :  { %3528 = vrcp.f32 %v939_v30 }
 0x355   :  { %3530 = vrcp.f32 %v949_v33 }
 0x35e   :  { %v3529_v37 = vpop.eup %3528 }
 0x35f   :  { %v955_v46 = vmul.f32 %v3529_v37, %v953_v36  ;;  %v3531_v48 = vpop.eup %3530 }
 0x360   :  { %v958_v50 = vsub.f32 1.0, %v3531_v48  ;;  %v962_v53 = vmul.f32 %v3531_v48, %v960_v51 }
 0x361   :  { %v956_v47 = vadd.f32 %v955_v46, %v4265_v44 }
 0x363   :  { %3532 = vtanh.f32 %v956_v47 }
 0x36d   :  { %v3533_v52 = vpop.eup %3532 }
 0x36e   :  { %v959_v54 = vmul.f32 %v3533_v52, %v958_v50 }
 0x370   :  { %v4313_v55 = vadd.f32 %v962_v53, %v959_v54 }
 0x372   :  { %v965_v56 = vrot.slane %v4313_v55, 2  ;;  %v1206_v20 = vrot.slane %v4313_v55, 6  ;;  %v1953_v31 = vrot.slane %v4313_v55, 1 }
 0x374   :  { %3105 = vmatmul.mubr.msk.f32.vlgmr.msra.gmra.mrb[8].mxu1 %vm472_vm4, %v965_v56  ;;  %3116 = vmatmul.mubr.msk.f32.vlgmr.msra.gmra.mrb[10].mxu0 %vm472_vm4, %v965_v56  ;;  %v2384_v58 = vsel %vm1964_vm5, %v2373_v57, %v965_v56  ;;  %v1965_v46 = vsel %vm1964_vm5, %v4280_v9, %v1953_v31 }
 0x375   :  { %3384 = vmatpush3.bf16.msra.mxu1 %v4215_v35  ;;  %3126 = vmatprep.mubr.msk.f32.mxu1 %vm3880_vm3, %v3879_v18 }
 0x376   :  { %3385 = vmatprep.subr.bf16.mxu1 %v3878_v12  ;;  %3390 = vmatpush3.bf16.msra.mxu0 %v4166_v21 }
 0x377   :  { %3391 = vmatprep.subr.bf16.mxu0 %v3878_v12  ;;  %3137 = vmatprep.mubr.msk.f32.mxu0 %vm3880_vm3, %v3879_v18 }
 0x379   :  { %3387 = vmatpush3.bf16.msra.mxu1 %v4231_v38 }
 0x37a   :  { %3394 = vmatprep.subr.bf16.mxu1 %v3878_v12  ;;  %3393 = vmatpush3.bf16.msra.mxu0 %v4184_v27 }
 0x37b   :  { %3400 = vmatprep.subr.bf16.mxu0 %v3878_v12 }
 0x37c   :  { %3127 = vmatmul.mubr.msk.f32.vlgmr.msra.gmra.mrb[10].mxu1 %vm472_vm4, %v965_v56 }
 0x37d   :  { %3396 = vmatpush3.bf16.msra.mxu1 %v4186_v28  ;;  %3148 = vmatprep.mubr.msk.f32.mxu1 %vm3880_vm3, %v3879_v18 }
 0x37e   :  { %3397 = vmatprep.subr.bf16.mxu1 %v3878_v12 }
 0x381   :  { %3399 = vmatpush3.bf16.msra.mxu1 %v4213_v34 }
 0x382   :  { %3406 = vmatprep.subr.bf16.mxu1 %v3878_v12 }
 0x447   :  { %v1034_v59 = vpop.f32.mrb[8].mxu1  ;;  %v1104_v60 = vpop.f32.mrb[10].mxu0 }
 0x448   :  { %v1035_v61 = vadd.f32 %v4267_v45, %v1034_v59  ;;  %v1105_v63 = vadd.f32 %v4270_v49, %v1104_v60  ;;  %v3106_v0 = vpop.f32.mrb[9].mxu1  ;;  %v3117_v1 = vpop.f32.mrb[11].mxu0 }
 0x44a   :  { %v1179_v2 = vrot.slane %v1035_v61, 4  ;;  %v1189_v3 = vrot.slane %v1105_v63, 4 }
 0x44c   :  { %v1181_v4 = vadd.f32 %v1179_v2, %v4259_v41  ;;  %v1191_v5 = vadd.f32 %v1189_v3, %v4261_v42 }
 0x44e   :  { %v2828_v6 = vmul.f32 -1.442695, %v1181_v4  ;;  %v2829_v7 = vmul.f32 -1.442695, %v1191_v5 }
 0x44f   :  { %v1174_v8 = vpop.f32.mrb[10].mxu1 }
 0x450   :  { %3534 = vpow2.f32 %v2828_v6  ;;  %v3128_v10 = vpop.f32.mrb[11].mxu1  ;;  %v1175_v16 = vadd.f32 %v4275_v62, %v1174_v8 }
 0x451   :  { %3536 = vpow2.f32 %v2829_v7 }
 0x452   :  { %v1199_v17 = vrot.slane %v1175_v16, 4 }
 0x45a   :  { %v3535_v11 = vpop.eup %3534 }
 0x45b   :  { %v3537_v13 = vpop.eup %3536  ;;  %v1185_v14 = vadd.f32 1.0, %v3535_v11 }
 0x45c   :  { %v1195_v15 = vadd.f32 1.0, %v3537_v13 }
 0x45d   :  { %3538 = vrcp.f32 %v1185_v14 }
 0x45e   :  { %3540 = vrcp.f32 %v1195_v15 }
 0x467   :  { %v3539_v19 = vpop.eup %3538 }
 0x468   :  { %v3541_v22 = vpop.eup %3540  ;;  %v1201_v23 = vmul.f32 %v3539_v19, %v1199_v17 }
 0x469   :  { %v1208_v24 = vmul.f32 %v3541_v22, %v1206_v20  ;;  %v1204_v26 = vsub.f32 1.0, %v3541_v22 }
 0x46a   :  { %v1202_v25 = vadd.f32 %v1201_v23, %v4265_v44 }
 0x46c   :  { %3542 = vtanh.f32 %v1202_v25 }
 0x476   :  { %v3543_v29 = vpop.eup %3542 }
 0x477   :  { %v1205_v30 = vmul.f32 %v3543_v29, %v1204_v26 }
 0x479   :  { %v1209_v32 = vadd.f32 %v1208_v24, %v1205_v30 }
 0x47b   :  { %v1211_v33 = vrot.slane %v1209_v32, 4  ;;  %v1955_v36 = vrot.slane %v1209_v32, 2  ;;  %v2376_v37 = vrot.slane %v1209_v32, 3  ;;  %v1452_v7 = vrot.slane %v1209_v32, 6 }
 0x47d   :  { %3138 = vmatmul.mubr.msk.f32.vlgmr.msra.gmra.mrb[12].mxu0 %vm472_vm4, %v1211_v33  ;;  %3149 = vmatmul.mubr.msk.f32.vlgmr.msra.gmra.mrb[12].mxu1 %vm472_vm4, %v1211_v33  ;;  %v1967_v47 = vsel %vm1966_vm6, %v1965_v46, %v1955_v36  ;;  %v2385_v48 = vsel %vm1966_vm6, %v2384_v58, %v2376_v37 }
 0x47e   :  { %3402 = vmatpush3.bf16.msra.mxu0 %v4215_v35  ;;  %3159 = vmatprep.mubr.msk.f32.mxu0 %vm3880_vm3, %v3879_v18 }
 0x47f   :  { %3403 = vmatprep.subr.bf16.mxu0 %v3878_v12  ;;  %3408 = vmatpush3.bf16.msra.mxu1 %v4166_v21 }
 0x480   :  { %3409 = vmatprep.subr.bf16.mxu1 %v3878_v12  ;;  %3170 = vmatprep.mubr.msk.f32.mxu1 %vm3880_vm3, %v3879_v18 }
 0x482   :  { %3405 = vmatpush3.bf16.msra.mxu0 %v4231_v38 }
 0x483   :  { %3412 = vmatprep.subr.bf16.mxu0 %v3878_v12  ;;  %3411 = vmatpush3.bf16.msra.mxu1 %v4184_v27 }
 0x484   :  { %3418 = vmatprep.subr.bf16.mxu1 %v3878_v12 }
 0x485   :  { %3160 = vmatmul.mubr.msk.f32.vlgmr.msra.gmra.mrb[14].mxu0 %vm472_vm4, %v1211_v33 }
 0x486   :  { %3414 = vmatpush3.bf16.msra.mxu0 %v4186_v28  ;;  %3181 = vmatprep.mubr.msk.f32.mxu0 %vm3880_vm3, %v3879_v18 }
 0x487   :  { %3415 = vmatprep.subr.bf16.mxu0 %v3878_v12 }
 0x48a   :  { %3417 = vmatpush3.bf16.msra.mxu0 %v4213_v34 }
 0x48b   :  { %3424 = vmatprep.subr.bf16.mxu0 %v3878_v12 }
 0x550   :  { %v1280_v9 = vpop.f32.mrb[12].mxu0  ;;  %v1350_v50 = vpop.f32.mrb[12].mxu1 }
 0x551   :  { %v1281_v51 = vadd.f32 %v4267_v45, %v1280_v9  ;;  %v1351_v52 = vadd.f32 %v4270_v49, %v1350_v50  ;;  %v3139_v53 = vpop.f32.mrb[13].mxu0  ;;  %v3150_v54 = vpop.f32.mrb[13].mxu1 }
 0x553   :  { %v1425_v55 = vrot.slane %v1281_v51, 2  ;;  %v1435_v56 = vrot.slane %v1351_v52, 2 }
 0x555   :  { %v1427_v57 = vadd.f32 %v1425_v55, %v4259_v41  ;;  %v1437_v58 = vadd.f32 %v1435_v56, %v4261_v42 }
 0x557   :  { %v2833_v59 = vmul.f32 -1.442695, %v1427_v57  ;;  %v2834_v60 = vmul.f32 -1.442695, %v1437_v58 }
 0x558   :  { %v1420_v61 = vpop.f32.mrb[14].mxu0 }
 0x559   :  { %3544 = vpow2.f32 %v2833_v59  ;;  %v3161_v63 = vpop.f32.mrb[15].mxu0  ;;  %v1421_v4 = vadd.f32 %v4275_v62, %v1420_v61 }
 0x55a   :  { %3546 = vpow2.f32 %v2834_v60  ;;  %v1975_v60 = vld [vmem:[%s4540_s11 + $0x8] sm:$0x3] }
 0x55b   :  { %v1445_v5 = vrot.slane %v1421_v4, 2 }
 0x563   :  { %v3545_v0 = vpop.eup %3544 }
 0x564   :  { %v3547_v1 = vpop.eup %3546  ;;  %v1431_v2 = vadd.f32 1.0, %v3545_v0 }
 0x565   :  { %v1441_v3 = vadd.f32 1.0, %v3547_v1 }
 0x566   :  { %3548 = vrcp.f32 %v1431_v2 }
 0x567   :  { %3550 = vrcp.f32 %v1441_v3 }
 0x570   :  { %v3549_v6 = vpop.eup %3548 }
 0x571   :  { %v3551_v41 = vpop.eup %3550  ;;  %v1447_v8 = vmul.f32 %v3549_v6, %v1445_v5 }
 0x572   :  { %v1454_v42 = vmul.f32 %v3551_v41, %v1452_v7  ;;  %v1450_v11 = vsub.f32 1.0, %v3551_v41 }
 0x573   :  { %v1448_v10 = vadd.f32 %v1447_v8, %v4265_v44 }
 0x575   :  { %3552 = vtanh.f32 %v1448_v10 }
 0x57f   :  { %v3553_v13 = vpop.eup %3552 }
 0x580   :  { %v1451_v14 = vmul.f32 %v3553_v13, %v1450_v11 }
 0x582   :  { %v1455_v15 = vadd.f32 %v1454_v42, %v1451_v14 }
 0x584   :  { %v1457_v16 = vrot.slane %v1455_v15, 6  ;;  %v1957_v17 = vrot.slane %v1455_v15, 3  ;;  %v2378_v19 = vrot.slane %v1455_v15, 4 }
 0x586   :  { %3171 = vmatmul.mubr.msk.f32.vlgmr.msra.gmra.mrb[14].mxu1 %vm472_vm4, %v1457_v16  ;;  %3182 = vmatmul.mubr.msk.f32.vlgmr.msra.gmra.mrb[16].mxu0 %vm472_vm4, %v1457_v16  ;;  %v1969_v20 = vsel %vm1968_vm7, %v1967_v47, %v1957_v17  ;;  %v2386_v22 = vsel %vm1968_vm7, %v2385_v48, %v2378_v19 }
 0x587   :  { %3420 = vmatpush3.bf16.msra.mxu1 %v4215_v35  ;;  %3192 = vmatprep.mubr.msk.f32.mxu1 %vm3880_vm3, %v3879_v18 }
 0x588   :  { %3421 = vmatprep.subr.bf16.mxu1 %v3878_v12  ;;  %3426 = vmatpush3.bf16.msra.mxu0 %v4166_v21 }
 0x589   :  { %3427 = vmatprep.subr.bf16.mxu0 %v3878_v12  ;;  %3203 = vmatprep.mubr.msk.f32.mxu0 %vm3880_vm3, %v3879_v18 }
 0x58b   :  { %3423 = vmatpush3.bf16.msra.mxu1 %v4231_v38 }
 0x58c   :  { %3430 = vmatprep.subr.bf16.mxu1 %v3878_v12  ;;  %3429 = vmatpush3.bf16.msra.mxu0 %v4184_v27 }
 0x58d   :  { %3436 = vmatprep.subr.bf16.mxu0 %v3878_v12 }
 0x58e   :  { %3193 = vmatmul.mubr.msk.f32.vlgmr.msra.gmra.mrb[16].mxu1 %vm472_vm4, %v1457_v16 }
 0x58f   :  { %3432 = vmatpush3.bf16.msra.mxu1 %v4186_v28  ;;  %3214 = vmatprep.mubr.msk.f32.mxu1 %vm3880_vm3, %v3879_v18 }
 0x590   :  { %3433 = vmatprep.subr.bf16.mxu1 %v3878_v12 }
 0x593   :  { %3435 = vmatpush3.bf16.msra.mxu1 %v4213_v34 }
 0x594   :  { %3442 = vmatprep.subr.bf16.mxu1 %v3878_v12 }
 0x659   :  { %v1526_v21 = vpop.f32.mrb[14].mxu1  ;;  %v1596_v44 = vpop.f32.mrb[16].mxu0 }
 0x65a   :  { %v1527_v23 = vadd.f32 %v4267_v45, %v1526_v21  ;;  %v1597_v27 = vadd.f32 %v4270_v49, %v1596_v44  ;;  %v3172_v24 = vpop.f32.mrb[15].mxu1  ;;  %v3183_v25 = vpop.f32.mrb[17].mxu0 }
 0x65c   :  { %v1670_v26 = vadd.f32 %v4255_v39, %v1527_v23  ;;  %v1677_v28 = vadd.f32 %v4257_v40, %v1597_v27 }
 0x65e   :  { %v2838_v29 = vmul.f32 -1.442695, %v1670_v26  ;;  %v2839_v32 = vmul.f32 -1.442695, %v1677_v28 }
 0x660   :  { %3554 = vpow2.f32 %v2838_v29 }
 0x661   :  { %v1666_v30 = vpop.f32.mrb[16].mxu1  ;;  %3556 = vpow2.f32 %v2839_v32 }
 0x662   :  { %v3194_v31 = vpop.f32.mrb[17].mxu1  ;;  %v1667_v46 = vadd.f32 %v4275_v62, %v1666_v30 }
 0x66a   :  { %v3555_v34 = vpop.eup %3554 }
 0x66b   :  { %v1674_v33 = vadd.f32 1.0, %v3555_v34  ;;  %v3557_v36 = vpop.eup %3556 }
 0x66c   :  { %v1681_v37 = vadd.f32 1.0, %v3557_v36 }
 0x66d   :  { %3558 = vrcp.f32 %v1674_v33 }
 0x66e   :  { %3560 = vrcp.f32 %v1681_v37  ;;  %v1939_v37 = vld [vmem:[#allocation13] sm:$0xff] }
 0x677   :  { %v3559_v47 = vpop.eup %3558 }
 0x678   :  { %v1684_v48 = vmul.f32 %v3559_v47, %v1667_v46  ;;  %v3561_v50 = vpop.eup %3560  ;;  %v1940_v46 = vld [vmem:[#allocation13 + $0x8] sm:$0xff]  ;;  %v1941_v47 = vld [vmem:[#allocation13 + $0x10] sm:$0xff] }
 0x679   :  { %v1687_v51 = vsub.f32 1.0, %v3561_v50  ;;  %v1690_v53 = vmul.f32 %v3561_v50, %v1457_v16 }
 0x67a   :  { %v1685_v9 = vadd.f32 %v4263_v43, %v1684_v48  ;;  %v4454_v48 = vpack.c.bf16 %v1940_v46, %v1939_v37 }
 0x67c   :  { %3562 = vtanh.f32 %v1685_v9  ;;  %v1942_v9 = vld [vmem:[#allocation13 + $0x18] sm:$0xff] }
 0x67d   :  { %v4457_v50 = vpack.c.bf16 %v1942_v9, %v1941_v47 }
 0x686   :  { %v3563_v52 = vpop.eup %3562 }
 0x687   :  { %v1688_v54 = vmul.f32 %v3563_v52, %v1687_v51  ;;  %v1943_v52 = vld [vmem:[#allocation14] sm:$0xff] }
 0x689   :  { %v1691_v55 = vadd.f32 %v1690_v53, %v1688_v54  ;;  %v1944_v53 = vld [vmem:[#allocation14 + $0x8] sm:$0xff] }
 0x68b   :  { %3204 = vmatmul.mubr.msk.f32.vlgmr.msra.gmra.mrb[18].mxu0 %vm472_vm4, %v1691_v55  ;;  %3215 = vmatmul.mubr.msk.f32.vlgmr.msra.gmra.mrb[18].mxu1 %vm472_vm4, %v1691_v55  ;;  %v1959_v56 = vrot.slane %v1691_v55, 4  ;;  %v2380_v57 = vrot.slane %v1691_v55, 5  ;;  %v1933_v19 = vrot.slane %v1691_v55, 6 }
 0x68c   :  { %3438 = vmatpush3.bf16.msra.mxu0 %v4215_v35  ;;  %3225 = vmatprep.mubr.msk.f32.mxu0 %vm3880_vm3, %v3879_v18  ;;  %v1974_v35 = vld [vmem:[%s4540_s11] sm:$0xff] }
 0x68d   :  { %3439 = vmatprep.subr.bf16.mxu0 %v3878_v12  ;;  %3232 = vmatprep.mubr.msk.f32.mxu1 %vm3880_vm3, %v3879_v18  ;;  %v1971_v58 = vsel %vm1970_vm8, %v1969_v20, %v1959_v56  ;;  %v2387_v59 = vsel %vm1970_vm8, %v2386_v22, %v2380_v57  ;;  %v3443_v61 = vpack.c.bf16 %v1975_v60, %v1974_v35  ;;  %v1945_v57 = vld [vmem:[#allocation14 + $0x10] sm:$0xff]  ;;  %v2855_v35 = vld [vmem:[%s4540_s11 + $0x10] sm:$0xff]  ;;  %v2856_v60 = vld [vmem:[%s4540_s11 + $0x18] sm:$0x3]  ;;  %s3882_s11 = smov [#allocation20]  }
 0x68e   :  { %s2790_s25 = sshll.u32 %s3882_s11, 4  ;;  %s2791_s25 = int_to_ptr.vmem [resolvable:$true] %s2790_s25 }
 0x68f   :  { %3445 = vmatpush3.bf16.xpose.msk.msra.mxu1 %vm4426_vm9, %v3443_v61  ;;  %s3828_s3 = scalar_lea.vmem %s2791_s25, 32  ;;  %p3833_p5 = scmp.lt.s32.totalorder %s2791_s25, %s2791_s25 }
 0x690   :  { %3441 = vmatpush3.bf16.msra.mxu0 %v4231_v38  ;;  %3456 = vmatprep.subr.bf16.mxu1 %v3878_v12  ;;  %v1948_v38 = vld [vmem:[#allocation17] sm:$0xff]  ;;  %p3829_p4 = scmp.ne.s32.totalorder %s2791_s25, %s3828_s3  ;;  %p3834_p6 = scmp.lt.s32.totalorder %s3828_s3, %s3828_s3 }
 0x691   :  { %3446 = vmatprep.subr.bf16.mxu0 %v3878_v12 }
 0x692   :  { %p3835_p7 = por %p3834_p6, %p3833_p5 }
 0x693   :  { %3226 = vmatmul.mubr.msk.f32.vlgmr.msra.gmra.mrb[20].mxu0 %vm472_vm4, %v1691_v55  ;;  %v3451_v55 = vpack.c.bf16 %v1944_v53, %v1943_v52 }
 0x694   :  { %3239 = vmatprep.mubr.msk.f32.mxu0 %vm3880_vm3, %v3879_v18  ;;  %3449 = vmatpush3.bf16.msk.msra.mxu0 %vm4447_vm14, %v3443_v61  ;;  %v3469_v61 = vpack.c.bf16 %v2856_v60, %v2855_v35  ;;  %p3836_p8 = pnand %p3835_p7, %p3829_p4 }
 0x695   :  { %3450 = vmatprep.subr.bf16.mxu0 %v3878_v12 }
 0x75e   :  { %v1761_v63 = vpop.f32.mrb[18].mxu0  ;;  %v1831_v0 = vpop.f32.mrb[18].mxu1 }
 0x75f   :  { %v1762_v1 = vadd.f32 %v4267_v45, %v1761_v63  ;;  %v1832_v2 = vadd.f32 %v4270_v49, %v1831_v0  ;;  %v3205_v3 = vpop.f32.mrb[19].mxu0  ;;  %v3216_v4 = vpop.f32.mrb[19].mxu1 }
 0x760   :  { %v1949_v3 = vld [vmem:[#allocation17 + $0x8] sm:$0xff] }
 0x761   :  { %v1906_v5 = vrot.slane %v1762_v1, 6  ;;  %v1916_v6 = vrot.slane %v1832_v2, 6  ;;  %v3463_v4 = vpack.c.bf16 %v1949_v3, %v1948_v38 }
 0x763   :  { %v1908_v7 = vadd.f32 %v4255_v39, %v1906_v5  ;;  %v1918_v41 = vadd.f32 %v4257_v40, %v1916_v6  ;;  %v1950_v5 = vld [vmem:[#allocation17 + $0x10] sm:$0xff]  ;;  %v1951_v6 = vld [vmem:[#allocation17 + $0x18] sm:$0xff] }
 0x765   :  { %v2843_v8 = vmul.f32 -1.442695, %v1908_v7  ;;  %v2844_v42 = vmul.f32 -1.442695, %v1918_v41  ;;  %v3466_v7 = vpack.c.bf16 %v1951_v6, %v1950_v5  ;;  %v2852_v41 = vld [vmem:[#allocation16] ss:$0 sm:$0xff] }
 0x766   :  { %v1901_v10 = vpop.f32.mrb[20].mxu0 }
 0x767   :  { %3564 = vpow2.f32 %v2843_v8  ;;  %v3227_v11 = vpop.f32.mrb[21].mxu0  ;;  %v1902_v49 = vadd.f32 %v4275_v62, %v1901_v10 }
 0x768   :  { %3566 = vpow2.f32 %v2844_v42 }
 0x769   :  { %v1926_v16 = vrot.slane %v1902_v49, 6 }
 0x771   :  { %v3565_v13 = vpop.eup %3564 }
 0x772   :  { %v3567_v14 = vpop.eup %3566  ;;  %v1912_v15 = vadd.f32 1.0, %v3565_v13 }
 0x773   :  { %v1922_v45 = vadd.f32 1.0, %v3567_v14 }
 0x774   :  { %3568 = vrcp.f32 %v1912_v15 }
 0x775   :  { %3570 = vrcp.f32 %v1922_v45 }
 0x77e   :  { %v3569_v17 = vpop.eup %3568 }
 0x77f   :  { %v3571_v39 = vpop.eup %3570  ;;  %v1928_v20 = vmul.f32 %v3569_v17, %v1926_v16 }
 0x780   :  { %v1935_v40 = vmul.f32 %v3571_v39, %v1933_v19  ;;  %v1931_v21 = vsub.f32 1.0, %v3571_v39 }
 0x781   :  { %v1929_v22 = vadd.f32 %v4263_v43, %v1928_v20 }
 0x783   :  { %3572 = vtanh.f32 %v1929_v22 }
 0x78d   :  { %v3573_v44 = vpop.eup %3572 }
 0x78e   :  { %v1932_v23 = vmul.f32 %v3573_v44, %v1931_v21 }
 0x790   :  { %v1936_v27 = vadd.f32 %v1935_v40, %v1932_v23 }
 0x792   :  { %v1962_v24 = vrot.slane %v1936_v27, 5  ;;  %v2382_v25 = vrot.slane %v1936_v27, 6  ;;  %1938 = vst.msk [vmem:[#allocation20 - $0x2] sm:$0xc] %vm1937_vm10, %v1936_v27 }
 0x794   :  { %v1973_v26 = vsel %vm1972_vm11, %v1971_v58, %v1962_v24  ;;  %v4439_v62 = vsel %vm1972_vm11, %v2387_v59, %v2382_v25  ;;  %v1946_v58 = vld [vmem:[#allocation14 + $0x18] sm:$0xff] }
 0x795   :  { %3233 = vmatmul.mubr.msk.f32.vlgmr.msra.gmra.mrb[20].mxu1 %vm472_vm4, %v1973_v26  ;;  %v3454_v59 = vpack.c.bf16 %v1946_v58, %v1945_v57 }
 0x796   :  { %3261 = vmatprep.mubr.msk.f32.mxu1 %vm3880_vm3, %v3879_v18  ;;  %3458 = vmatpush3.bf16.msra.mxu1 %v4454_v48 }
 0x797   :  { %3459 = vmatprep.subr.bf16.mxu1 %v3878_v12 }
 0x79a   :  { %3461 = vmatpush3.bf16.msra.mxu1 %v4457_v50 }
 0x79b   :  { %3468 = vmatprep.subr.bf16.mxu1 %v3878_v12 }
 0x868   :  { %v2051_v43 = vpop.f32.mrb[20].mxu1 }
 0x869   :  { %v3234_v28 = vpop.f32.mrb[21].mxu1  ;;  %v2056_v29 = vsel %vm2055_vm12, %v2051_v43, -inf }
 0x86a   :  { %2057 = vmax.xlane.f32.xlu1 %v2056_v29 }
 0x8f7   :  { %v2058_v30 = vpop.xlane.xlu1 %2057 }
 0x8f8   :  { %v2059_v31 = vsub.f32 %v2051_v43, %v2058_v30 }
 0x8fa   :  { %v2060_v32 = vmul.f32 1.442695, %v2059_v31 }
 0x8fc   :  { %3574 = vpow2.f32 %v2060_v32 }
 0x906   :  { %v3575_v34 = vpop.eup %3574 }
 0x907   :  { %v2062_v33 = vsel %vm2055_vm12, %v3575_v34, 0.0 }
 0x908   :  { %2063 = vadd.xlane.f32.xlu1 %v2062_v33 }
 0x995   :  { %v2064_v51 = vpop.xlane.xlu1 %2063 }
 0x996   :  { %3576 = vrcp.f32 %v2064_v51 }
 0x9a0   :  { %v3577_v54 = vpop.eup %3576 }
 0x9a1   :  { %v2066_v56 = vmul.f32 %v3577_v54, %v3575_v34 }
 0x9a3   :  { %3240 = vmatmul.mubr.msk.f32.vlgmr.msra.gmra.mrb[22].mxu0 %vm2067_vm15, %v2066_v56 }
 0x9a4   :  { %3452 = vmatpush3.bf16.msra.mxu0 %v3451_v55  ;;  %3250 = vmatprep.mubr.msk.f32.mxu0 %vm3880_vm3, %v3879_v18 }
 0x9a5   :  { %3453 = vmatprep.subr.bf16.mxu0 %v3878_v12 }
 0x9a8   :  { %3455 = vmatpush3.bf16.msra.mxu0 %v3454_v59 }
 0x9a9   :  { %3462 = vmatprep.subr.bf16.mxu0 %v3878_v12 }
 0x9ab   :  { %3251 = vmatmul.mubr.msk.f32.vlgmr.msra.gmra.mrb[24].mxu0 %vm472_vm4, %v1973_v26 }
 0x9ac   :  { %3272 = vmatprep.mubr.msk.f32.mxu0 %vm3880_vm3, %v3879_v18  ;;  %3464 = vmatpush3.bf16.msra.mxu0 %v3463_v4 }
 0x9ad   :  { %3465 = vmatprep.subr.bf16.mxu0 %v3878_v12 }
 0x9b0   :  { %3467 = vmatpush3.bf16.msra.mxu0 %v3466_v7 }
 0x9b1   :  { %3472 = vmatprep.subr.bf16.mxu0 %v3878_v12 }
 0xa76   :  { %v2139_v63 = vpop.f32.mrb[22].mxu0 }
 0xa77   :  { %v3241_v0 = vpop.f32.mrb[23].mxu0  ;;  %3262 = vmatmul.mubr.msk.f32.vlgmr.msra.gmra.mrb[22].mxu1 %vm472_vm4, %v2139_v63 }
 0xa78   :  { %3471 = vmatpush3.bf16.xpose.msk.msra.mxu1 %vm4426_vm9, %v3469_v61  ;;  %3279 = vmatprep.mubr.msk.f32.mxu1 %vm3880_vm3, %v3879_v18 }
 0xa79   :  { %3476 = vmatprep.subr.bf16.mxu1 %v3878_v12 }
 0xa7e   :  { %v2209_v1 = vpop.f32.mrb[24].mxu0 }
 0xa7f   :  { %v3252_v2 = vpop.f32.mrb[25].mxu0  ;;  %3280 = vmatmul.mubr.msk.f32.vlgmr.msra.gmra.mrb[24].mxu1 %vm472_vm4, %v4439_v62 }
 0xa80   :  { %3478 = vmatpush3.bf16.msra.mxu1 %v3451_v55  ;;  %3297 = vmatprep.mubr.msk.f32.mxu1 %vm3880_vm3, %v3879_v18 }
 0xa81   :  { %3479 = vmatprep.subr.bf16.mxu1 %v3878_v12 }
 0xa84   :  { %3481 = vmatpush3.bf16.msra.mxu1 %v3454_v59 }
 0xa85   :  { %3488 = vmatprep.subr.bf16.mxu1 %v3878_v12 }
 0xa87   :  { %3298 = vmatmul.mubr.msk.f32.vlgmr.msra.gmra.mrb[26].mxu1 %vm472_vm4, %v4439_v62 }
 0xa88   :  { %3319 = vmatprep.mubr.msk.f32.mxu1 %vm3880_vm3, %v3879_v18  ;;  %3490 = vmatpush3.bf16.msra.mxu1 %v3463_v4 }
 0xa89   :  { %3491 = vmatprep.subr.bf16.mxu1 %v3878_v12 }
 0xa8c   :  { %3493 = vmatpush3.bf16.msra.mxu1 %v3466_v7 }
 0xb4a   :  { %v2282_v8 = vpop.f32.mrb[22].mxu1 }
 0xb4b   :  { %v2283_v42 = vadd.f32 %v2282_v8, %v2209_v1  ;;  %v3263_v10 = vpop.f32.mrb[23].mxu1 }
 0xb4d   :  { %v2292_v11 = vadd.f32 %v2852_v41, %v2283_v42 }
 0xb4f   :  { %3578 = vtanh.f32 %v2292_v11 }
 0xb52   :  { %v2467_v13 = vpop.f32.mrb[24].mxu1 }
 0xb53   :  { %v3281_v14 = vpop.f32.mrb[25].mxu1  ;;  %v2471_v15 = vsel %vm2055_vm12, %v2467_v13, -inf }
 0xb54   :  { %2472 = vmax.xlane.f32.xlu0 %v2471_v15 }
 0xb59   :  { %v3579_v45 = vpop.eup %3578 }
 0xb5a   :  { %v2623_v49 = vpop.f32.mrb[26].mxu1  ;;  %3273 = vmatmul.mubr.msk.f32.vlgmr.msra.gmra.mrb[26].mxu0 %vm472_vm4, %v3579_v45 }
 0xb5b   :  { %v3299_v16 = vpop.f32.mrb[27].mxu1  ;;  %3475 = vmatpush3.bf16.msk.msra.mxu0 %vm4447_vm14, %v3469_v61  ;;  %3286 = vmatprep.mubr.msk.f32.mxu0 %vm3880_vm3, %v3879_v18 }
 0xb5c   :  { %3482 = vmatprep.subr.bf16.mxu0 %v3878_v12 }
 0xbe1   :  { %v2473_v17 = vpop.xlane.xlu0 %2472 }
 0xbe2   :  { %v2474_v19 = vsub.f32 %v2467_v13, %v2473_v17 }
 0xbe4   :  { %v2475_v39 = vmul.f32 1.442695, %v2474_v19 }
 0xbe6   :  { %3580 = vpow2.f32 %v2475_v39 }
 0xbf0   :  { %v3581_v20 = vpop.eup %3580 }
 0xbf1   :  { %v2477_v40 = vsel %vm2055_vm12, %v3581_v20, 0.0 }
 0xbf2   :  { %2478 = vadd.xlane.f32.xlu1 %v2477_v40 }
 0xc2d   :  { %v2369_v22 = vpop.f32.mrb[26].mxu0 }
 0xc2e   :  { %v3274_v21 = vpop.f32.mrb[27].mxu0 }
 0xc7f   :  { %v2479_v44 = vpop.xlane.xlu1 %2478 }
 0xc80   :  { %3582 = vrcp.f32 %v2479_v44 }
 0xc8a   :  { %v3583_v23 = vpop.eup %3582 }
 0xc8b   :  { %v2481_v27 = vmul.f32 %v3583_v23, %v3581_v20 }
 0xc8d   :  { %3287 = vmatmul.mubr.msk.f32.vlgmr.msra.gmra.mrb[28].mxu0 %vm2067_vm15, %v2481_v27 }
 0xc8e   :  { %3484 = vmatpush3.bf16.msra.mxu0 %v4454_v48  ;;  %3308 = vmatprep.mubr.msk.f32.mxu0 %vm3880_vm3, %v3879_v18 }
 0xc8f   :  { %3485 = vmatprep.subr.bf16.mxu0 %v3878_v12 }
 0xc92   :  { %3487 = vmatpush3.bf16.msra.mxu0 %v4457_v50 }
 0xd60   :  { %v2553_v24 = vpop.f32.mrb[28].mxu0 }
 0xd61   :  { %v3288_v25 = vpop.f32.mrb[29].mxu0  ;;  %3309 = vmatmul.mubr.msk.f32.vlgmr.msra.gmra.mrb[30].mxu0 %vm472_vm4, %v2553_v24 }
 0xe34   :  { %v2696_v26 = vpop.f32.mrb[30].mxu0 }
 0xe35   :  { %v2697_v62 = vadd.f32 %v2696_v26, %v2623_v49  ;;  %v3310_v43 = vpop.f32.mrb[31].mxu0 }
 0xe37   :  { %v2700_v28 = vadd.f32 %v2852_v41, %v2697_v62 }
 0xe39   :  { %3584 = vtanh.f32 %v2700_v28 }
 0xe43   :  { %v3585_v29 = vpop.eup %3584 }
 0xe44   :  { %3320 = vmatmul.mubr.msk.f32.vlgmr.msra.gmra.mrb[28].mxu1 %vm472_vm4, %v3585_v29 }
 0xe45   :  { %3839 = shalt.err (!%p3836_p8)
}
 0xe46   :  { %s3840_s29 = scalar_lea.hbm %s4547_s18, 32 }
 0xe47   :  { %p3841_p9 = scmp.ne.s32.totalorder %s4547_s18, %s3840_s29  ;;  %p3844_p10 = scmp.lt.u32.totalorder %s3840_s29, %s4547_s18 }
 0xe49   :  { %p3846_p11 = pnand %p3844_p10, %p3841_p9 }
 0xe4b   :  { %3849 = shalt.err (!%p3846_p11)
}
 0xe4c   :  { %2793 = dma.vmem_to_hbm [thread:$0]  %s2791_s25, 32, %s4547_s18, [#allocation4]   ;;  %v2853_v12 = vld [vmem:[#allocation19] ss:$0 sm:$0xff]  ;;  %vm2778_vm0 = vcmask 1045504  }
 0xe4d   :  { %v2370_v32 = vadd.f32 %v2853_v12, %v2369_v22 }
 0xf17   :  { %v2771_v18 = vpop.f32.mrb[28].mxu1 }
 0xf18   :  { %v2772_v30 = vadd.f32 %v2853_v12, %v2771_v18  ;;  %v3321_v31 = vpop.f32.mrb[29].mxu1 }
 0xf1a   :  { %v2776_v34 = vrot.slane %v2772_v30, 2 }
 0xf1c   :  { %v2779_v33 = vsel %vm2778_vm0, %v2370_v32, %v2776_v34  ;;  %2781 = vst [vmem:[%s4546_s17 + $0x8] sm:$0xf] %v2776_v34 }
 0xf1d   :  { %2780 = vst [vmem:[%s4546_s17] sm:$0xff] %v2779_v33 }
 0xf1e   :  { %3862 = dma.done.wait [#allocation4], 32  }
 0xf1f   :  { %3863 = vsyncadd [#allocation4], 4294967264 }
 0xf20   :  { %2799 = vsyncpa [#allocation3], 1 }
 0xf21   :  { %2800 = vsyncpa [#allocation6], 1 }
 0xf22   :  { %2801 = vsyncpa [#allocation9], 1 }
 0xf23   :  { %2802 = vsyncpa [#allocation12], 1 }
 0xf24   :  { %2803 = vsyncpa [#allocation15], 1 }
 0xf25   :  { %2804 = vsyncpa [#allocation18], 1 }
 0xf26   :  { %2805 = vsyncpa [#allocation4], 1 }

</bundles_post_ra>
